<compile_context>
chip_gen: v6e
topology: v6e:2x2x1
jax: 0.10.0
libtpu: 0.0.40
codegen_flags: <defaults>
</compile_context>

<pallas_src>
import numpy as np

import jax
import jax.numpy as jnp
from jax.experimental import pallas as pl
from jax.experimental.pallas import tpu as pltpu


# ----------------------------------------------------------------------------
# Model configuration (matches the PyTorch CNN instantiation).
# ----------------------------------------------------------------------------
CONV_KERNELS = [3, 3, 3, 3]
PADDINGS = [1, 1, 1, 1]
STRIDES = [1, 1, 1, 1]
CHANNELS = [4, 8, 8, 16]
POOL_KERNELS = [2, 2, 1, 1]      # MaxPool for even blocks, AvgPool for odd blocks
IN_CHANNELS = 1
BN_EPS = 1e-5


def _layer_configs(spatial):
    """Static per-block dims.  `spatial` is the (square) freq == time size."""
    cfgs = []
    cin = IN_CHANNELS
    s = spatial
    for i, cout in enumerate(CHANNELS):
        assert CONV_KERNELS[i] == 3 and STRIDES[i] == 1 and PADDINGS[i] == 1
        assert POOL_KERNELS[i] in (1, 2)
        cfgs.append(dict(s=s, cin=cin, cout=cout, pool=POOL_KERNELS[i],
                         mode="max" if i % 2 == 0 else "avg"))
        s //= POOL_KERNELS[i]
        cin = cout
    return cfgs


# ----------------------------------------------------------------------------
# Fused Pallas kernel (entire forward pass for one batch element per grid step)
# ----------------------------------------------------------------------------
def _make_fused_kernel(cfgs, n_params):
    """kernel(x_ref, *param_refs, o_ref, *pad_scratch_refs)."""

    def kernel(x_ref, *refs):
        params = iter(refs[:n_params])
        o_ref = refs[n_params]
        pad_refs = refs[n_params + 1:]

        # Activation layout: rows = time, lanes = freq*C (lane = f*C + c).
        y = x_ref[0].astype(jnp.float32)                    # (T, F), Cin == 1

        for li, cfg in enumerate(cfgs):
            s, cin = cfg["s"], cfg["cin"]
            m0, m1, m2, shift = (next(params), next(params),
                                 next(params), next(params))
            pad = pad_refs[li]

            # In-VMEM zero-padded activation (pad = 1 on both spatial dims).
            pad[...] = jnp.zeros_like(pad)
            pad[1:s + 1, cin:cin + s * cin] = y

            # conv3x3 (BN scale folded into m0/m1/m2) as 3 banded matmuls.
            acc = jnp.dot(pad[0:s, :], m0[...],
                          preferred_element_type=jnp.float32)
            acc = acc + jnp.dot(pad[1:s + 1, :], m1[...],
                                preferred_element_type=jnp.float32)
            acc = acc + jnp.dot(pad[2:s + 2, :], m2[...],
                                preferred_element_type=jnp.float32)

            # bias + BN shift (pre-folded) + ReLU.
            y = jnp.maximum(acc + shift[...], 0.0)          # (s, s*cout)

            # Fused 2x2 pooling; 1x1 pools (blocks 2, 3) are identity -> skip.
            if cfg["pool"] == 2:
                if cfg["mode"] == "max":
                    re, ro, ce, co = (next(params), next(params),
                                      next(params), next(params))
                    rows = jnp.maximum(
                        jnp.dot(re[...], y, preferred_element_type=jnp.float32),
                        jnp.dot(ro[...], y, preferred_element_type=jnp.float32))
                    y = jnp.maximum(
                        jnp.dot(rows, ce[...], preferred_element_type=jnp.float32),
                        jnp.dot(rows, co[...], preferred_element_type=jnp.float32))
                else:  # avg
                    ra, ca = next(params), next(params)
                    y = jnp.dot(
                        jnp.dot(ra[...], y, preferred_element_type=jnp.float32),
                        ca[...], preferred_element_type=jnp.float32)
            # TODO(synk): nn.Dropout2d is identity at inference; train-mode
            # channel dropout (with RNG) is not implemented.

        # (T_out, F_out*C_out) == PyTorch permute(0,3,2,1).reshape layout.
        o_ref[0] = y.astype(o_ref.dtype)

    return kernel


# ----------------------------------------------------------------------------
# Parameters: raw Conv/BN params + host-side folding into kernel-ready matrices
# ----------------------------------------------------------------------------
def init_raw_params(key):
    raw = []
    cin = IN_CHANNELS
    for cout in CHANNELS:
        key, kw, kb, kg, kbt, km, kv = jax.random.split(key, 7)
        # Conv kernel laid out (dt, df, cin, cout): tap axis 0 runs over time,
        # axis 1 over freq.  Equivalent PyTorch weight (cout, cin, kF, kT)
        # would satisfy w_pt[co, ci, j, i] == w[i, j, ci, co].
        w = 0.1 * jax.random.normal(kw, (3, 3, cin, cout), jnp.float32)
        b = 0.05 * jax.random.normal(kb, (cout,), jnp.float32)
        gamma = 1.0 + 0.1 * jax.random.normal(kg, (cout,), jnp.float32)
        beta = 0.05 * jax.random.normal(kbt, (cout,), jnp.float32)
        mean = 0.05 * jax.random.normal(km, (cout,), jnp.float32)
        var = jax.random.uniform(kv, (cout,), jnp.float32, 0.5, 1.5)
        raw.append(dict(w=w, b=b, gamma=gamma, beta=beta, mean=mean, var=var))
        cin = cout
    return raw


def _row_select(h, parity):
    s = np.zeros((h // 2, h), np.float32)
    for hp in range(h // 2):
        s[hp, 2 * hp + parity] = 1.0
    return s


def _col_select(w, c, parity):
    s = np.zeros((w * c, (w // 2) * c), np.float32)
    for wp in range(w // 2):
        for ch in range(c):
            s[(2 * wp + parity) * c + ch, wp * c + ch] = 1.0
    return s


def build_kernel_params(raw, spatial):
    """Fold eval-BN + bias into banded conv matrices / shift rows and build the
    0/1 pooling selection matrices (all host-side, once at init)."""
    cfgs = _layer_configs(spatial)
    flat = []
    for cfg, rp in zip(cfgs, raw):
        s, cin, cout = cfg["s"], cfg["cin"], cfg["cout"]
        w = np.asarray(rp["w"], np.float32)                        # (3,3,cin,cout)
        scale = np.asarray(rp["gamma"]) / np.sqrt(np.asarray(rp["var"]) + BN_EPS)
        shift = (np.asarray(rp["beta"]) - np.asarray(rp["mean"]) * scale
                 + np.asarray(rp["b"]) * scale)                    # bias folded in

        # Banded matrices: out[t, f*cout+co] = sum_i pad[t+i, :] @ m_i with
        # m_i[(f+j)*cin+ci, f*cout+co] = w[i, j, ci, co] * bn_scale[co].
        for i in range(3):
            m = np.zeros(((s + 2) * cin, s * cout), np.float32)
            w_i = (w[i] * scale[None, None, :]).astype(np.float32)  # (3,cin,cout)
            for j in range(3):
                for f in range(s):
                    m[(f + j) * cin:(f + j + 1) * cin,
                      f * cout:(f + 1) * cout] = w_i[j]
            flat.append(jnp.asarray(m))
        flat.append(jnp.asarray(
            np.tile(shift.astype(np.float32)[None, :], (1, s))))    # (1, s*cout)

        if cfg["pool"] == 2:
            re, ro = _row_select(s, 0), _row_select(s, 1)
            ce, co = _col_select(s, cout, 0), _col_select(s, cout, 1)
            if cfg["mode"] == "max":
                flat += [jnp.asarray(re), jnp.asarray(ro),
                         jnp.asarray(ce), jnp.asarray(co)]
            else:
                flat += [jnp.asarray((0.5 * (re + ro)).astype(np.float32)),
                         jnp.asarray((0.5 * (ce + co)).astype(np.float32))]
    return flat


# ----------------------------------------------------------------------------
# Forward pass (single fused pallas_call)
# ----------------------------------------------------------------------------
@jax.jit
def forward(x, kparams):
    """x: (B, freq, time) -> (B, time_out, freq_out * CHANNELS[-1])."""
    b, f, t = x.shape
    assert f == t, "this fused kernel assumes square (freq, time) inputs"
    cfgs = _layer_configs(t)
    s_out = cfgs[-1]["s"] // cfgs[-1]["pool"]
    c_out = CHANNELS[-1]

    # Rows = time, lanes = freq: one tiny input transpose so the kernel can
    # emit the final (B, T, F*C) layout directly (no post-processing shuffle).
    xt = jnp.swapaxes(x, 1, 2).astype(jnp.float32)                 # (B, T, F)

    in_specs = [pl.BlockSpec((1, t, f), lambda i: (i, 0, 0))]
    in_specs += [pl.BlockSpec(p.shape, lambda i: (0, 0)) for p in kparams]
    out_spec = pl.BlockSpec((1, s_out, s_out * c_out), lambda i: (i, 0, 0))
    scratch = [pltpu.VMEM((c["s"] + 2, (c["s"] + 2) * c["cin"]), jnp.float32)
               for c in cfgs]

    kernel = _make_fused_kernel(cfgs, len(kparams))
    return pl.pallas_call(
        kernel,
        out_shape=jax.ShapeDtypeStruct((b, s_out, s_out * c_out), jnp.float32),
        grid_spec=pltpu.PrefetchScalarGridSpec(
            num_scalar_prefetch=0,
            grid=(b,),                                 # one batch item per step
            in_specs=in_specs,
            out_specs=out_spec,
            scratch_shapes=scratch),
        compiler_params=pltpu.CompilerParams(
            dimension_semantics=("parallel",)),        # megacore split on v7x
    )(xt, *kparams)


# ----------------------------------------------------------------------------
# Plain-JAX reference (same math; used only for a numerical sanity check)
# ----------------------------------------------------------------------------
def reference_forward(x, raw):
    y = jnp.swapaxes(x, 1, 2)[..., None].astype(jnp.float32)      # (B, T, F, 1)
    for i, rp in enumerate(raw):
        y = jax.lax.conv_general_dilated(
            y, rp["w"], window_strides=(1, 1), padding=((1, 1), (1, 1)),
            dimension_numbers=("NHWC", "HWIO", "NHWC"),
            precision=jax.lax.Precision.HIGHEST)
        scale = rp["gamma"] / jnp.sqrt(rp["var"] + BN_EPS)
        y = jnp.maximum((y + rp["b"]) * scale + (rp["beta"] - rp["mean"] * scale), 0.0)
        pk = POOL_KERNELS[i]
        if pk > 1:
            if i % 2 == 0:
                y = jax.lax.reduce_window(y, -jnp.inf, jax.lax.max,
                                          (1, pk, pk, 1), (1, pk, pk, 1), "VALID")
            else:
                y = jax.lax.reduce_window(y, 0.0, jax.lax.add,
                                          (1, pk, pk, 1), (1, pk, pk, 1),
                                          "VALID") / (pk * pk)
    bsz, tt, ff, cc = y.shape
    return y.reshape(bsz, tt, ff * cc)


if __name__ == "__main__":
    key = jax.random.PRNGKey(0)
    key, kx = jax.random.split(key)
    x = jax.random.normal(kx, (2, 16, 16), jnp.float32)   # (batch, freq, time)

    raw = init_raw_params(key)
    kparams = build_kernel_params(raw, spatial=x.shape[1])

    out = jax.block_until_ready(forward(x, kparams))
    # freq/time: 16 ->(pool2) 8 ->(pool2) 4 ->(pool1) 4 ->(pool1) 4
    assert out.shape == (2, 4, 4 * CHANNELS[-1]), out.shape

    ref = jax.block_until_ready(reference_forward(x, raw))
    np.testing.assert_allclose(np.asarray(out), np.asarray(ref),
                               rtol=2e-2, atol=2e-2)

    print("KERNEL_OK")
</pallas_src>

<mosaic_0001>
module attributes {stable_mosaic.version = 11 : i64} {
  func.func @kernel(%arg0: i32, %arg1: memref<1x16x16xf32, #tpu.memory_space<vmem>>, %arg2: memref<18x64xf32, #tpu.memory_space<vmem>>, %arg3: memref<18x64xf32, #tpu.memory_space<vmem>>, %arg4: memref<18x64xf32, #tpu.memory_space<vmem>>, %arg5: memref<1x64xf32, #tpu.memory_space<vmem>>, %arg6: memref<8x16xf32, #tpu.memory_space<vmem>>, %arg7: memref<8x16xf32, #tpu.memory_space<vmem>>, %arg8: memref<64x32xf32, #tpu.memory_space<vmem>>, %arg9: memref<64x32xf32, #tpu.memory_space<vmem>>, %arg10: memref<40x64xf32, #tpu.memory_space<vmem>>, %arg11: memref<40x64xf32, #tpu.memory_space<vmem>>, %arg12: memref<40x64xf32, #tpu.memory_space<vmem>>, %arg13: memref<1x64xf32, #tpu.memory_space<vmem>>, %arg14: memref<4x8xf32, #tpu.memory_space<vmem>>, %arg15: memref<64x32xf32, #tpu.memory_space<vmem>>, %arg16: memref<48x32xf32, #tpu.memory_space<vmem>>, %arg17: memref<48x32xf32, #tpu.memory_space<vmem>>, %arg18: memref<48x32xf32, #tpu.memory_space<vmem>>, %arg19: memref<1x32xf32, #tpu.memory_space<vmem>>, %arg20: memref<48x64xf32, #tpu.memory_space<vmem>>, %arg21: memref<48x64xf32, #tpu.memory_space<vmem>>, %arg22: memref<48x64xf32, #tpu.memory_space<vmem>>, %arg23: memref<1x64xf32, #tpu.memory_space<vmem>>, %arg24: memref<1x4x64xf32, #tpu.memory_space<vmem>>, %arg25: memref<18x18xf32, #tpu.memory_space<vmem>>, %arg26: memref<10x40xf32, #tpu.memory_space<vmem>>, %arg27: memref<6x48xf32, #tpu.memory_space<vmem>>, %arg28: memref<6x48xf32, #tpu.memory_space<vmem>>) attributes {dimension_semantics = [#tpu.dimension_semantics<parallel>], iteration_bounds = array<i64: 2>, scalar_prefetch = 0 : i64, scratch_operands = 4 : i64, tpu.core_type = #tpu.core_type<tc>, window_params = [{transform_indices = @transform_0, window_bounds = array<i64: 1, 16, 16>}, {pipeline_mode = #tpu.pipeline_mode<synchronous>, transform_indices = @transform_1, window_bounds = array<i64: 18, 64>}, {pipeline_mode = #tpu.pipeline_mode<synchronous>, transform_indices = @transform_2, window_bounds = array<i64: 18, 64>}, {pipeline_mode = #tpu.pipeline_mode<synchronous>, transform_indices = @transform_3, window_bounds = array<i64: 18, 64>}, {pipeline_mode = #tpu.pipeline_mode<synchronous>, transform_indices = @transform_4, window_bounds = array<i64: 1, 64>}, {pipeline_mode = #tpu.pipeline_mode<synchronous>, transform_indices = @transform_5, window_bounds = array<i64: 8, 16>}, {pipeline_mode = #tpu.pipeline_mode<synchronous>, transform_indices = @transform_6, window_bounds = array<i64: 8, 16>}, {pipeline_mode = #tpu.pipeline_mode<synchronous>, transform_indices = @transform_7, window_bounds = array<i64: 64, 32>}, {pipeline_mode = #tpu.pipeline_mode<synchronous>, transform_indices = @transform_8, window_bounds = array<i64: 64, 32>}, {pipeline_mode = #tpu.pipeline_mode<synchronous>, transform_indices = @transform_9, window_bounds = array<i64: 40, 64>}, {pipeline_mode = #tpu.pipeline_mode<synchronous>, transform_indices = @transform_10, window_bounds = array<i64: 40, 64>}, {pipeline_mode = #tpu.pipeline_mode<synchronous>, transform_indices = @transform_11, window_bounds = array<i64: 40, 64>}, {pipeline_mode = #tpu.pipeline_mode<synchronous>, transform_indices = @transform_12, window_bounds = array<i64: 1, 64>}, {pipeline_mode = #tpu.pipeline_mode<synchronous>, transform_indices = @transform_13, window_bounds = array<i64: 4, 8>}, {pipeline_mode = #tpu.pipeline_mode<synchronous>, transform_indices = @transform_14, window_bounds = array<i64: 64, 32>}, {pipeline_mode = #tpu.pipeline_mode<synchronous>, transform_indices = @transform_15, window_bounds = array<i64: 48, 32>}, {pipeline_mode = #tpu.pipeline_mode<synchronous>, transform_indices = @transform_16, window_bounds = array<i64: 48, 32>}, {pipeline_mode = #tpu.pipeline_mode<synchronous>, transform_indices = @transform_17, window_bounds = array<i64: 48, 32>}, {pipeline_mode = #tpu.pipeline_mode<synchronous>, transform_indices = @transform_18, window_bounds = array<i64: 1, 32>}, {pipeline_mode = #tpu.pipeline_mode<synchronous>, transform_indices = @transform_19, window_bounds = array<i64: 48, 64>}, {pipeline_mode = #tpu.pipeline_mode<synchronous>, transform_indices = @transform_20, window_bounds = array<i64: 48, 64>}, {pipeline_mode = #tpu.pipeline_mode<synchronous>, transform_indices = @transform_21, window_bounds = array<i64: 48, 64>}, {pipeline_mode = #tpu.pipeline_mode<synchronous>, transform_indices = @transform_22, window_bounds = array<i64: 1, 64>}, {transform_indices = @transform_23, window_bounds = array<i64: 1, 4, 64>}]} {
    %c0 = arith.constant 0 : index
    %c0_0 = arith.constant 0 : index
    %c0_1 = arith.constant 0 : index
    %0 = vector.load %arg1[%c0, %c0_0, %c0_1] : memref<1x16x16xf32, #tpu.memory_space<vmem>>, vector<1x16x16xf32>
    %1 = vector.shape_cast %0 : vector<1x16x16xf32> to vector<16x16xf32>
    %cst = arith.constant 0.000000e+00 : f32
    %2 = vector.broadcast %cst : f32 to vector<18x18xf32>
    %c0_2 = arith.constant 0 : index
    %c0_3 = arith.constant 0 : index
    %3 = vector.load %arg25[%c0_2, %c0_3] : memref<18x18xf32, #tpu.memory_space<vmem>>, vector<18x18xf32>
    tpu.vector_store %arg25[%c0_2, %c0_3], %2 {strides = array<i32>} : memref<18x18xf32, #tpu.memory_space<vmem>>, vector<18x18xf32>,
    %c1 = arith.constant 1 : index
    %c1_4 = arith.constant 1 : index
    %4 = vector.load %arg25[%c1, %c1_4] : memref<18x18xf32, #tpu.memory_space<vmem>>, vector<16x16xf32>
    tpu.vector_store %arg25[%c1, %c1_4], %1 {strides = array<i32>} : memref<18x18xf32, #tpu.memory_space<vmem>>, vector<16x16xf32>,
    %c0_5 = arith.constant 0 : index
    %c0_6 = arith.constant 0 : index
    %5 = vector.load %arg25[%c0_5, %c0_6] : memref<18x18xf32, #tpu.memory_space<vmem>>, vector<16x18xf32>
    %c0_7 = arith.constant 0 : index
    %c0_8 = arith.constant 0 : index
    %6 = vector.load %arg2[%c0_7, %c0_8] : memref<18x64xf32, #tpu.memory_space<vmem>>, vector<18x64xf32>
    %cst_9 = arith.constant dense<0.000000e+00> : vector<16x64xf32>
    %7 = tpu.matmul %5, %6, %cst_9 {dimension_numbers = #tpu.dot_dimension_numbers<[1], [0], [0], [1], [0, 0, 1, 1], [], []>} : vector<16x18xf32>, vector<18x64xf32>, vector<16x64xf32> -> vector<16x64xf32>
    %c1_10 = arith.constant 1 : index
    %c0_11 = arith.constant 0 : index
    %8 = vector.load %arg25[%c1_10, %c0_11] : memref<18x18xf32, #tpu.memory_space<vmem>>, vector<16x18xf32>
    %c0_12 = arith.constant 0 : index
    %c0_13 = arith.constant 0 : index
    %9 = vector.load %arg3[%c0_12, %c0_13] : memref<18x64xf32, #tpu.memory_space<vmem>>, vector<18x64xf32>
    %cst_14 = arith.constant dense<0.000000e+00> : vector<16x64xf32>
    %10 = tpu.matmul %8, %9, %cst_14 {dimension_numbers = #tpu.dot_dimension_numbers<[1], [0], [0], [1], [0, 0, 1, 1], [], []>} : vector<16x18xf32>, vector<18x64xf32>, vector<16x64xf32> -> vector<16x64xf32>
    %11 = arith.addf %7, %10 : vector<16x64xf32>
    %c2 = arith.constant 2 : index
    %c0_15 = arith.constant 0 : index
    %12 = vector.load %arg25[%c2, %c0_15] : memref<18x18xf32, #tpu.memory_space<vmem>>, vector<16x18xf32>
    %c0_16 = arith.constant 0 : index
    %c0_17 = arith.constant 0 : index
    %13 = vector.load %arg4[%c0_16, %c0_17] : memref<18x64xf32, #tpu.memory_space<vmem>>, vector<18x64xf32>
    %cst_18 = arith.constant dense<0.000000e+00> : vector<16x64xf32>
    %14 = tpu.matmul %12, %13, %cst_18 {dimension_numbers = #tpu.dot_dimension_numbers<[1], [0], [0], [1], [0, 0, 1, 1], [], []>} : vector<16x18xf32>, vector<18x64xf32>, vector<16x64xf32> -> vector<16x64xf32>
    %15 = arith.addf %11, %14 : vector<16x64xf32>
    %c0_19 = arith.constant 0 : index
    %c0_20 = arith.constant 0 : index
    %16 = vector.load %arg5[%c0_19, %c0_20] : memref<1x64xf32, #tpu.memory_space<vmem>>, vector<1x64xf32>
    %17 = vector.broadcast %16 : vector<1x64xf32> to vector<16x64xf32>
    %18 = arith.addf %15, %17 : vector<16x64xf32>
    %cst_21 = arith.constant 0.000000e+00 : f32
    %19 = vector.broadcast %cst_21 : f32 to vector<16x64xf32>
    %20 = arith.maximumf %18, %19 : vector<16x64xf32>
    %c0_22 = arith.constant 0 : index
    %c0_23 = arith.constant 0 : index
    %21 = vector.load %arg6[%c0_22, %c0_23] : memref<8x16xf32, #tpu.memory_space<vmem>>, vector<8x16xf32>
    %cst_24 = arith.constant dense<0.000000e+00> : vector<8x64xf32>
    %22 = tpu.matmul %21, %20, %cst_24 {dimension_numbers = #tpu.dot_dimension_numbers<[1], [0], [0], [1], [0, 0, 1, 1], [], []>} : vector<8x16xf32>, vector<16x64xf32>, vector<8x64xf32> -> vector<8x64xf32>
    %c0_25 = arith.constant 0 : index
    %c0_26 = arith.constant 0 : index
    %23 = vector.load %arg7[%c0_25, %c0_26] : memref<8x16xf32, #tpu.memory_space<vmem>>, vector<8x16xf32>
    %cst_27 = arith.constant dense<0.000000e+00> : vector<8x64xf32>
    %24 = tpu.matmul %23, %20, %cst_27 {dimension_numbers = #tpu.dot_dimension_numbers<[1], [0], [0], [1], [0, 0, 1, 1], [], []>} : vector<8x16xf32>, vector<16x64xf32>, vector<8x64xf32> -> vector<8x64xf32>
    %25 = arith.maximumf %22, %24 : vector<8x64xf32>
    %c0_28 = arith.constant 0 : index
    %c0_29 = arith.constant 0 : index
    %26 = vector.load %arg8[%c0_28, %c0_29] : memref<64x32xf32, #tpu.memory_space<vmem>>, vector<64x32xf32>
    %cst_30 = arith.constant dense<0.000000e+00> : vector<8x32xf32>
    %27 = tpu.matmul %25, %26, %cst_30 {dimension_numbers = #tpu.dot_dimension_numbers<[1], [0], [0], [1], [0, 0, 1, 1], [], []>} : vector<8x64xf32>, vector<64x32xf32>, vector<8x32xf32> -> vector<8x32xf32>
    %c0_31 = arith.constant 0 : index
    %c0_32 = arith.constant 0 : index
    %28 = vector.load %arg9[%c0_31, %c0_32] : memref<64x32xf32, #tpu.memory_space<vmem>>, vector<64x32xf32>
    %cst_33 = arith.constant dense<0.000000e+00> : vector<8x32xf32>
    %29 = tpu.matmul %25, %28, %cst_33 {dimension_numbers = #tpu.dot_dimension_numbers<[1], [0], [0], [1], [0, 0, 1, 1], [], []>} : vector<8x64xf32>, vector<64x32xf32>, vector<8x32xf32> -> vector<8x32xf32>
    %30 = arith.maximumf %27, %29 : vector<8x32xf32>
    %cst_34 = arith.constant 0.000000e+00 : f32
    %31 = vector.broadcast %cst_34 : f32 to vector<10x40xf32>
    %c0_35 = arith.constant 0 : index
    %c0_36 = arith.constant 0 : index
    %32 = vector.load %arg26[%c0_35, %c0_36] : memref<10x40xf32, #tpu.memory_space<vmem>>, vector<10x40xf32>
    tpu.vector_store %arg26[%c0_35, %c0_36], %31 {strides = array<i32>} : memref<10x40xf32, #tpu.memory_space<vmem>>, vector<10x40xf32>,
    %c1_37 = arith.constant 1 : index
    %c4 = arith.constant 4 : index
    %33 = vector.load %arg26[%c1_37, %c4] : memref<10x40xf32, #tpu.memory_space<vmem>>, vector<8x32xf32>
    tpu.vector_store %arg26[%c1_37, %c4], %30 {strides = array<i32>} : memref<10x40xf32, #tpu.memory_space<vmem>>, vector<8x32xf32>,
    %c0_38 = arith.constant 0 : index
    %c0_39 = arith.constant 0 : index
    %34 = vector.load %arg26[%c0_38, %c0_39] : memref<10x40xf32, #tpu.memory_space<vmem>>, vector<8x40xf32>
    %c0_40 = arith.constant 0 : index
    %c0_41 = arith.constant 0 : index
    %35 = vector.load %arg10[%c0_40, %c0_41] : memref<40x64xf32, #tpu.memory_space<vmem>>, vector<40x64xf32>
    %cst_42 = arith.constant dense<0.000000e+00> : vector<8x64xf32>
    %36 = tpu.matmul %34, %35, %cst_42 {dimension_numbers = #tpu.dot_dimension_numbers<[1], [0], [0], [1], [0, 0, 1, 1], [], []>} : vector<8x40xf32>, vector<40x64xf32>, vector<8x64xf32> -> vector<8x64xf32>
    %c1_43 = arith.constant 1 : index
    %c0_44 = arith.constant 0 : index
    %37 = vector.load %arg26[%c1_43, %c0_44] : memref<10x40xf32, #tpu.memory_space<vmem>>, vector<8x40xf32>
    %c0_45 = arith.constant 0 : index
    %c0_46 = arith.constant 0 : index
    %38 = vector.load %arg11[%c0_45, %c0_46] : memref<40x64xf32, #tpu.memory_space<vmem>>, vector<40x64xf32>
    %cst_47 = arith.constant dense<0.000000e+00> : vector<8x64xf32>
    %39 = tpu.matmul %37, %38, %cst_47 {dimension_numbers = #tpu.dot_dimension_numbers<[1], [0], [0], [1], [0, 0, 1, 1], [], []>} : vector<8x40xf32>, vector<40x64xf32>, vector<8x64xf32> -> vector<8x64xf32>
    %40 = arith.addf %36, %39 : vector<8x64xf32>
    %c2_48 = arith.constant 2 : index
    %c0_49 = arith.constant 0 : index
    %41 = vector.load %arg26[%c2_48, %c0_49] : memref<10x40xf32, #tpu.memory_space<vmem>>, vector<8x40xf32>
    %c0_50 = arith.constant 0 : index
    %c0_51 = arith.constant 0 : index
    %42 = vector.load %arg12[%c0_50, %c0_51] : memref<40x64xf32, #tpu.memory_space<vmem>>, vector<40x64xf32>
    %cst_52 = arith.constant dense<0.000000e+00> : vector<8x64xf32>
    %43 = tpu.matmul %41, %42, %cst_52 {dimension_numbers = #tpu.dot_dimension_numbers<[1], [0], [0], [1], [0, 0, 1, 1], [], []>} : vector<8x40xf32>, vector<40x64xf32>, vector<8x64xf32> -> vector<8x64xf32>
    %44 = arith.addf %40, %43 : vector<8x64xf32>
    %c0_53 = arith.constant 0 : index
    %c0_54 = arith.constant 0 : index
    %45 = vector.load %arg13[%c0_53, %c0_54] : memref<1x64xf32, #tpu.memory_space<vmem>>, vector<1x64xf32>
    %46 = vector.broadcast %45 : vector<1x64xf32> to vector<8x64xf32>
    %47 = arith.addf %44, %46 : vector<8x64xf32>
    %cst_55 = arith.constant 0.000000e+00 : f32
    %48 = vector.broadcast %cst_55 : f32 to vector<8x64xf32>
    %49 = arith.maximumf %47, %48 : vector<8x64xf32>
    %c0_56 = arith.constant 0 : index
    %c0_57 = arith.constant 0 : index
    %50 = vector.load %arg14[%c0_56, %c0_57] : memref<4x8xf32, #tpu.memory_space<vmem>>, vector<4x8xf32>
    %cst_58 = arith.constant dense<0.000000e+00> : vector<4x64xf32>
    %51 = tpu.matmul %50, %49, %cst_58 {dimension_numbers = #tpu.dot_dimension_numbers<[1], [0], [0], [1], [0, 0, 1, 1], [], []>} : vector<4x8xf32>, vector<8x64xf32>, vector<4x64xf32> -> vector<4x64xf32>
    %c0_59 = arith.constant 0 : index
    %c0_60 = arith.constant 0 : index
    %52 = vector.load %arg15[%c0_59, %c0_60] : memref<64x32xf32, #tpu.memory_space<vmem>>, vector<64x32xf32>
    %cst_61 = arith.constant dense<0.000000e+00> : vector<4x32xf32>
    %53 = tpu.matmul %51, %52, %cst_61 {dimension_numbers = #tpu.dot_dimension_numbers<[1], [0], [0], [1], [0, 0, 1, 1], [], []>} : vector<4x64xf32>, vector<64x32xf32>, vector<4x32xf32> -> vector<4x32xf32>
    %cst_62 = arith.constant 0.000000e+00 : f32
    %54 = vector.broadcast %cst_62 : f32 to vector<6x48xf32>
    %c0_63 = arith.constant 0 : index
    %c0_64 = arith.constant 0 : index
    %55 = vector.load %arg27[%c0_63, %c0_64] : memref<6x48xf32, #tpu.memory_space<vmem>>, vector<6x48xf32>
    tpu.vector_store %arg27[%c0_63, %c0_64], %54 {strides = array<i32>} : memref<6x48xf32, #tpu.memory_space<vmem>>, vector<6x48xf32>,
    %c1_65 = arith.constant 1 : index
    %c8 = arith.constant 8 : index
    %56 = vector.load %arg27[%c1_65, %c8] : memref<6x48xf32, #tpu.memory_space<vmem>>, vector<4x32xf32>
    tpu.vector_store %arg27[%c1_65, %c8], %53 {strides = array<i32>} : memref<6x48xf32, #tpu.memory_space<vmem>>, vector<4x32xf32>,
    %c0_66 = arith.constant 0 : index
    %c0_67 = arith.constant 0 : index
    %57 = vector.load %arg27[%c0_66, %c0_67] : memref<6x48xf32, #tpu.memory_space<vmem>>, vector<4x48xf32>
    %c0_68 = arith.constant 0 : index
    %c0_69 = arith.constant 0 : index
    %58 = vector.load %arg16[%c0_68, %c0_69] : memref<48x32xf32, #tpu.memory_space<vmem>>, vector<48x32xf32>
    %cst_70 = arith.constant dense<0.000000e+00> : vector<4x32xf32>
    %59 = tpu.matmul %57, %58, %cst_70 {dimension_numbers = #tpu.dot_dimension_numbers<[1], [0], [0], [1], [0, 0, 1, 1], [], []>} : vector<4x48xf32>, vector<48x32xf32>, vector<4x32xf32> -> vector<4x32xf32>
    %c1_71 = arith.constant 1 : index
    %c0_72 = arith.constant 0 : index
    %60 = vector.load %arg27[%c1_71, %c0_72] : memref<6x48xf32, #tpu.memory_space<vmem>>, vector<4x48xf32>
    %c0_73 = arith.constant 0 : index
    %c0_74 = arith.constant 0 : index
    %61 = vector.load %arg17[%c0_73, %c0_74] : memref<48x32xf32, #tpu.memory_space<vmem>>, vector<48x32xf32>
    %cst_75 = arith.constant dense<0.000000e+00> : vector<4x32xf32>
    %62 = tpu.matmul %60, %61, %cst_75 {dimension_numbers = #tpu.dot_dimension_numbers<[1], [0], [0], [1], [0, 0, 1, 1], [], []>} : vector<4x48xf32>, vector<48x32xf32>, vector<4x32xf32> -> vector<4x32xf32>
    %63 = arith.addf %59, %62 : vector<4x32xf32>
    %c2_76 = arith.constant 2 : index
    %c0_77 = arith.constant 0 : index
    %64 = vector.load %arg27[%c2_76, %c0_77] : memref<6x48xf32, #tpu.memory_space<vmem>>, vector<4x48xf32>
    %c0_78 = arith.constant 0 : index
    %c0_79 = arith.constant 0 : index
    %65 = vector.load %arg18[%c0_78, %c0_79] : memref<48x32xf32, #tpu.memory_space<vmem>>, vector<48x32xf32>
    %cst_80 = arith.constant dense<0.000000e+00> : vector<4x32xf32>
    %66 = tpu.matmul %64, %65, %cst_80 {dimension_numbers = #tpu.dot_dimension_numbers<[1], [0], [0], [1], [0, 0, 1, 1], [], []>} : vector<4x48xf32>, vector<48x32xf32>, vector<4x32xf32> -> vector<4x32xf32>
    %67 = arith.addf %63, %66 : vector<4x32xf32>
    %c0_81 = arith.constant 0 : index
    %c0_82 = arith.constant 0 : index
    %68 = vector.load %arg19[%c0_81, %c0_82] : memref<1x32xf32, #tpu.memory_space<vmem>>, vector<1x32xf32>
    %69 = vector.broadcast %68 : vector<1x32xf32> to vector<4x32xf32>
    %70 = arith.addf %67, %69 : vector<4x32xf32>
    %cst_83 = arith.constant 0.000000e+00 : f32
    %71 = vector.broadcast %cst_83 : f32 to vector<4x32xf32>
    %72 = arith.maximumf %70, %71 : vector<4x32xf32>
    %cst_84 = arith.constant 0.000000e+00 : f32
    %73 = vector.broadcast %cst_84 : f32 to vector<6x48xf32>
    %c0_85 = arith.constant 0 : index
    %c0_86 = arith.constant 0 : index
    %74 = vector.load %arg28[%c0_85, %c0_86] : memref<6x48xf32, #tpu.memory_space<vmem>>, vector<6x48xf32>
    tpu.vector_store %arg28[%c0_85, %c0_86], %73 {strides = array<i32>} : memref<6x48xf32, #tpu.memory_space<vmem>>, vector<6x48xf32>,
    %c1_87 = arith.constant 1 : index
    %c8_88 = arith.constant 8 : index
    %75 = vector.load %arg28[%c1_87, %c8_88] : memref<6x48xf32, #tpu.memory_space<vmem>>, vector<4x32xf32>
    tpu.vector_store %arg28[%c1_87, %c8_88], %72 {strides = array<i32>} : memref<6x48xf32, #tpu.memory_space<vmem>>, vector<4x32xf32>,
    %c0_89 = arith.constant 0 : index
    %c0_90 = arith.constant 0 : index
    %76 = vector.load %arg28[%c0_89, %c0_90] : memref<6x48xf32, #tpu.memory_space<vmem>>, vector<4x48xf32>
    %c0_91 = arith.constant 0 : index
    %c0_92 = arith.constant 0 : index
    %77 = vector.load %arg20[%c0_91, %c0_92] : memref<48x64xf32, #tpu.memory_space<vmem>>, vector<48x64xf32>
    %cst_93 = arith.constant dense<0.000000e+00> : vector<4x64xf32>
    %78 = tpu.matmul %76, %77, %cst_93 {dimension_numbers = #tpu.dot_dimension_numbers<[1], [0], [0], [1], [0, 0, 1, 1], [], []>} : vector<4x48xf32>, vector<48x64xf32>, vector<4x64xf32> -> vector<4x64xf32>
    %c1_94 = arith.constant 1 : index
    %c0_95 = arith.constant 0 : index
    %79 = vector.load %arg28[%c1_94, %c0_95] : memref<6x48xf32, #tpu.memory_space<vmem>>, vector<4x48xf32>
    %c0_96 = arith.constant 0 : index
    %c0_97 = arith.constant 0 : index
    %80 = vector.load %arg21[%c0_96, %c0_97] : memref<48x64xf32, #tpu.memory_space<vmem>>, vector<48x64xf32>
    %cst_98 = arith.constant dense<0.000000e+00> : vector<4x64xf32>
    %81 = tpu.matmul %79, %80, %cst_98 {dimension_numbers = #tpu.dot_dimension_numbers<[1], [0], [0], [1], [0, 0, 1, 1], [], []>} : vector<4x48xf32>, vector<48x64xf32>, vector<4x64xf32> -> vector<4x64xf32>
    %82 = arith.addf %78, %81 : vector<4x64xf32>
    %c2_99 = arith.constant 2 : index
    %c0_100 = arith.constant 0 : index
    %83 = vector.load %arg28[%c2_99, %c0_100] : memref<6x48xf32, #tpu.memory_space<vmem>>, vector<4x48xf32>
    %c0_101 = arith.constant 0 : index
    %c0_102 = arith.constant 0 : index
    %84 = vector.load %arg22[%c0_101, %c0_102] : memref<48x64xf32, #tpu.memory_space<vmem>>, vector<48x64xf32>
    %cst_103 = arith.constant dense<0.000000e+00> : vector<4x64xf32>
    %85 = tpu.matmul %83, %84, %cst_103 {dimension_numbers = #tpu.dot_dimension_numbers<[1], [0], [0], [1], [0, 0, 1, 1], [], []>} : vector<4x48xf32>, vector<48x64xf32>, vector<4x64xf32> -> vector<4x64xf32>
    %86 = arith.addf %82, %85 : vector<4x64xf32>
    %c0_104 = arith.constant 0 : index
    %c0_105 = arith.constant 0 : index
    %87 = vector.load %arg23[%c0_104, %c0_105] : memref<1x64xf32, #tpu.memory_space<vmem>>, vector<1x64xf32>
    %88 = vector.broadcast %87 : vector<1x64xf32> to vector<4x64xf32>
    %89 = arith.addf %86, %88 : vector<4x64xf32>
    %cst_106 = arith.constant 0.000000e+00 : f32
    %90 = vector.broadcast %cst_106 : f32 to vector<4x64xf32>
    %91 = arith.maximumf %89, %90 : vector<4x64xf32>
    %c0_107 = arith.constant 0 : index
    %c0_108 = arith.constant 0 : index
    %c0_109 = arith.constant 0 : index
    %92 = vector.load %arg24[%c0_107, %c0_108, %c0_109] : memref<1x4x64xf32, #tpu.memory_space<vmem>>, vector<1x4x64xf32>
    %93 = vector.shape_cast %92 : vector<1x4x64xf32> to vector<4x64xf32>
    %94 = vector.shape_cast %91 : vector<4x64xf32> to vector<1x4x64xf32>
    tpu.vector_store %arg24[%c0_107, %c0_108, %c0_109], %94 {strides = array<i32>} : memref<1x4x64xf32, #tpu.memory_space<vmem>>, vector<1x4x64xf32>,
    return
  }
  func.func @transform_0(%arg0: i32) -> (i32, i32, i32) {
    %c0_i32 = arith.constant 0 : i32
    %c0_i32_0 = arith.constant 0 : i32
    %c0_i32_1 = arith.constant 0 : i32
    return %arg0, %c0_i32, %c0_i32_0 : i32, i32, i32
  }
  func.func @transform_1(%arg0: i32) -> (i32, i32) {
    %c0_i32 = arith.constant 0 : i32
    %c0_i32_0 = arith.constant 0 : i32
    %c0_i32_1 = arith.constant 0 : i32
    return %c0_i32, %c0_i32_0 : i32, i32
  }
  func.func @transform_2(%arg0: i32) -> (i32, i32) {
    %c0_i32 = arith.constant 0 : i32
    %c0_i32_0 = arith.constant 0 : i32
    %c0_i32_1 = arith.constant 0 : i32
    return %c0_i32, %c0_i32_0 : i32, i32
  }
  func.func @transform_3(%arg0: i32) -> (i32, i32) {
    %c0_i32 = arith.constant 0 : i32
    %c0_i32_0 = arith.constant 0 : i32
    %c0_i32_1 = arith.constant 0 : i32
    return %c0_i32, %c0_i32_0 : i32, i32
  }
  func.func @transform_4(%arg0: i32) -> (i32, i32) {
    %c0_i32 = arith.constant 0 : i32
    %c0_i32_0 = arith.constant 0 : i32
    %c0_i32_1 = arith.constant 0 : i32
    return %c0_i32, %c0_i32_0 : i32, i32
  }
  func.func @transform_5(%arg0: i32) -> (i32, i32) {
    %c0_i32 = arith.constant 0 : i32
    %c0_i32_0 = arith.constant 0 : i32
    %c0_i32_1 = arith.constant 0 : i32
    return %c0_i32, %c0_i32_0 : i32, i32
  }
  func.func @transform_6(%arg0: i32) -> (i32, i32) {
    %c0_i32 = arith.constant 0 : i32
    %c0_i32_0 = arith.constant 0 : i32
    %c0_i32_1 = arith.constant 0 : i32
    return %c0_i32, %c0_i32_0 : i32, i32
  }
  func.func @transform_7(%arg0: i32) -> (i32, i32) {
    %c0_i32 = arith.constant 0 : i32
    %c0_i32_0 = arith.constant 0 : i32
    %c0_i32_1 = arith.constant 0 : i32
    return %c0_i32, %c0_i32_0 : i32, i32
  }
  func.func @transform_8(%arg0: i32) -> (i32, i32) {
    %c0_i32 = arith.constant 0 : i32
    %c0_i32_0 = arith.constant 0 : i32
    %c0_i32_1 = arith.constant 0 : i32
    return %c0_i32, %c0_i32_0 : i32, i32
  }
  func.func @transform_9(%arg0: i32) -> (i32, i32) {
    %c0_i32 = arith.constant 0 : i32
    %c0_i32_0 = arith.constant 0 : i32
    %c0_i32_1 = arith.constant 0 : i32
    return %c0_i32, %c0_i32_0 : i32, i32
  }
  func.func @transform_10(%arg0: i32) -> (i32, i32) {
    %c0_i32 = arith.constant 0 : i32
    %c0_i32_0 = arith.constant 0 : i32
    %c0_i32_1 = arith.constant 0 : i32
    return %c0_i32, %c0_i32_0 : i32, i32
  }
  func.func @transform_11(%arg0: i32) -> (i32, i32) {
    %c0_i32 = arith.constant 0 : i32
    %c0_i32_0 = arith.constant 0 : i32
    %c0_i32_1 = arith.constant 0 : i32
    return %c0_i32, %c0_i32_0 : i32, i32
  }
  func.func @transform_12(%arg0: i32) -> (i32, i32) {
    %c0_i32 = arith.constant 0 : i32
    %c0_i32_0 = arith.constant 0 : i32
    %c0_i32_1 = arith.constant 0 : i32
    return %c0_i32, %c0_i32_0 : i32, i32
  }
  func.func @transform_13(%arg0: i32) -> (i32, i32) {
    %c0_i32 = arith.constant 0 : i32
    %c0_i32_0 = arith.constant 0 : i32
    %c0_i32_1 = arith.constant 0 : i32
    return %c0_i32, %c0_i32_0 : i32, i32
  }
  func.func @transform_14(%arg0: i32) -> (i32, i32) {
    %c0_i32 = arith.constant 0 : i32
    %c0_i32_0 = arith.constant 0 : i32
    %c0_i32_1 = arith.constant 0 : i32
    return %c0_i32, %c0_i32_0 : i32, i32
  }
  func.func @transform_15(%arg0: i32) -> (i32, i32) {
    %c0_i32 = arith.constant 0 : i32
    %c0_i32_0 = arith.constant 0 : i32
    %c0_i32_1 = arith.constant 0 : i32
    return %c0_i32, %c0_i32_0 : i32, i32
  }
  func.func @transform_16(%arg0: i32) -> (i32, i32) {
    %c0_i32 = arith.constant 0 : i32
    %c0_i32_0 = arith.constant 0 : i32
    %c0_i32_1 = arith.constant 0 : i32
    return %c0_i32, %c0_i32_0 : i32, i32
  }
  func.func @transform_17(%arg0: i32) -> (i32, i32) {
    %c0_i32 = arith.constant 0 : i32
    %c0_i32_0 = arith.constant 0 : i32
    %c0_i32_1 = arith.constant 0 : i32
    return %c0_i32, %c0_i32_0 : i32, i32
  }
  func.func @transform_18(%arg0: i32) -> (i32, i32) {
    %c0_i32 = arith.constant 0 : i32
    %c0_i32_0 = arith.constant 0 : i32
    %c0_i32_1 = arith.constant 0 : i32
    return %c0_i32, %c0_i32_0 : i32, i32
  }
  func.func @transform_19(%arg0: i32) -> (i32, i32) {
    %c0_i32 = arith.constant 0 : i32
    %c0_i32_0 = arith.constant 0 : i32
    %c0_i32_1 = arith.constant 0 : i32
    return %c0_i32, %c0_i32_0 : i32, i32
  }
  func.func @transform_20(%arg0: i32) -> (i32, i32) {
    %c0_i32 = arith.constant 0 : i32
    %c0_i32_0 = arith.constant 0 : i32
    %c0_i32_1 = arith.constant 0 : i32
    return %c0_i32, %c0_i32_0 : i32, i32
  }
  func.func @transform_21(%arg0: i32) -> (i32, i32) {
    %c0_i32 = arith.constant 0 : i32
    %c0_i32_0 = arith.constant 0 : i32
    %c0_i32_1 = arith.constant 0 : i32
    return %c0_i32, %c0_i32_0 : i32, i32
  }
  func.func @transform_22(%arg0: i32) -> (i32, i32) {
    %c0_i32 = arith.constant 0 : i32
    %c0_i32_0 = arith.constant 0 : i32
    %c0_i32_1 = arith.constant 0 : i32
    return %c0_i32, %c0_i32_0 : i32, i32
  }
  func.func @transform_23(%arg0: i32) -> (i32, i32, i32) {
    %c0_i32 = arith.constant 0 : i32
    %c0_i32_0 = arith.constant 0 : i32
    %c0_i32_1 = arith.constant 0 : i32
    return %arg0, %c0_i32, %c0_i32_0 : i32, i32, i32
  }
}

</mosaic_0001>

<bundles_post_ra>
// kernel: forward.1
= control target key start
LH: loop header
LB: loop body
LE: loop exit
PB: predicated region body
PF: predicated region fallthrough
CT: control target
= control target key end

     0   :  { %s3444_s0 = inlined_call_operand.vmem [shape: f32[2,16,16], index: 0, kind: input, shape index: {}]   ;;  %s3445_s1 = inlined_call_operand.vmem [shape: f32[18,64], index: 1, kind: input, shape index: {}]   ;;  %s3446_s2 = inlined_call_operand.vmem [shape: f32[18,64], index: 2, kind: input, shape index: {}]   ;;  %s3447_s3 = inlined_call_operand.vmem [shape: f32[18,64], index: 3, kind: input, shape index: {}]   ;;  %s3448_s4 = inlined_call_operand.vmem [shape: f32[1,64], index: 4, kind: input, shape index: {}]   ;;  %s3449_s5 = inlined_call_operand.vmem [shape: f32[8,16], index: 5, kind: input, shape index: {}]   ;;  %s3450_s6 = inlined_call_operand.vmem [shape: f32[8,16], index: 6, kind: input, shape index: {}]   ;;  %s3451_s7 = inlined_call_operand.vmem [shape: f32[64,32], index: 7, kind: input, shape index: {}]   ;;  %s3452_s8 = inlined_call_operand.vmem [shape: f32[64,32], index: 8, kind: input, shape index: {}]   ;;  %s3453_s9 = inlined_call_operand.vmem [shape: f32[40,64], index: 9, kind: input, shape index: {}]   ;;  %s3454_s10 = inlined_call_operand.vmem [shape: f32[40,64], index: 10, kind: input, shape index: {}]   ;;  %s3455_s11 = inlined_call_operand.vmem [shape: f32[40,64], index: 11, kind: input, shape index: {}]   ;;  %s3456_s12 = inlined_call_operand.vmem [shape: f32[1,64], index: 12, kind: input, shape index: {}]   ;;  %s3457_s13 = inlined_call_operand.vmem [shape: f32[4,8], index: 13, kind: input, shape index: {}]   ;;  %s3458_s14 = inlined_call_operand.vmem [shape: f32[64,32], index: 14, kind: input, shape index: {}]   ;;  %s3459_s15 = inlined_call_operand.vmem [shape: f32[48,32], index: 15, kind: input, shape index: {}]   ;;  %s3460_s16 = inlined_call_operand.vmem [shape: f32[48,32], index: 16, kind: input, shape index: {}]   ;;  %s3461_s17 = inlined_call_operand.vmem [shape: f32[48,32], index: 17, kind: input, shape index: {}]   ;;  %s3462_s18 = inlined_call_operand.vmem [shape: f32[1,32], index: 18, kind: input, shape index: {}]   ;;  %s3463_s19 = inlined_call_operand.vmem [shape: f32[48,64], index: 19, kind: input, shape index: {}]   ;;  %s3464_s20 = inlined_call_operand.vmem [shape: f32[48,64], index: 20, kind: input, shape index: {}]   ;;  %s3465_s21 = inlined_call_operand.vmem [shape: f32[48,64], index: 21, kind: input, shape index: {}]   ;;  %s3466_s22 = inlined_call_operand.vmem [shape: f32[1,64], index: 22, kind: input, shape index: {}]   ;;  %s3467_s23 = inlined_call_operand.hbm [shape: f32[2,4,64], index: 23, kind: output, shape index: {}]  }
   0x1   :  { %3483 = sst [smem:[#allocation16_spill]] %s3444_s0 }
   0x2   :  { %3484 = sst [smem:[#allocation17_spill]] %s3445_s1 }
   0x3   :  { %3485 = sst [smem:[#allocation18_spill]] %s3446_s2 }
   0x4   :  { %3486 = sst [smem:[#allocation19_spill]] %s3447_s3 }
   0x5   :  { %3487 = sst [smem:[#allocation20_spill]] %s3448_s4 }
   0x6   :  { %3488 = sst [smem:[#allocation21_spill]] %s3449_s5 }
   0x7   :  { %3489 = sst [smem:[#allocation22_spill]] %s3450_s6 }
   0x8   :  { %3490 = sst [smem:[#allocation23_spill]] %s3451_s7 }
   0x9   :  { %3491 = sst [smem:[#allocation24_spill]] %s3452_s8 }
   0xa   :  { %3492 = sst [smem:[#allocation25_spill]] %s3453_s9 }
   0xb   :  { %3493 = sst [smem:[#allocation26_spill]] %s3466_s22 }
   0xc   :  { %3494 = sst [smem:[#allocation27_spill]] %s3467_s23 }
   0xd   :  { %28 = vsyncpa [#allocation7], 0 }
   0xe   :  { %30 = vsyncpa [#allocation7 + $0x1], 0  ;;  %s2936_s4 = smov 0   ;;  %s2938_s30 = smov 0  }
   0xf   :  { %s2940_s24 = smov 0   ;;  %s2942_s25 = smov 0  }
  0x10 LB: > { %3495 = sst [smem:[#allocation9_spill]] %s2796_s4  ;;  %s2957_s5 = sadd.s32 4294967295, %s2808_s25   ;;  %s2808_s25 = sphi %s2942_s25, %s3522_s25   ;;  %s2804_s24 = sphi %s2940_s24, %s3524_s24   ;;  %s2800_s30 = sphi %s2938_s30, %s3526_s30   ;;  %s2796_s4 = sphi %s2936_s4, %s3525_s4  }
  0x11   : > { %3496 = sst [smem:[#allocation10_spill]] %s2804_s24  ;;  %s2322_s1 = sadd.s32 4294967294, %s2808_s25  }
  0x12   : > { %3497 = sst [smem:[#allocation11_spill]] %s2808_s25  ;;  %s2961_s26 = sadd.s32 1, %s2808_s25  }
  0x13   : > { %3498 = sst [smem:[#allocation12_spill]] %s2961_s26  ;;  %s531_s2 = sadd.s32 1, %s2804_s24 }
  0x14   : > { %s528_s6 = ssub.s32 %s2808_s25, %s2961_s26  ;;  %p541_p0 = scmp.ne.s32.totalorder %s2804_s24, %s2800_s30 }
  0x15   : > { %p529_p1 = scmp.eq.s32.totalorder %s528_s6, 0  ;;  %p542_p2 = scmp.eq.s32.totalorder %s2957_s5, 1 }
  0x16   : > { %p547_p3 = scmp.ne.s32.totalorder %s2800_s30, %s2796_s4  ;;  %p548_p4 = scmp.eq.s32.totalorder %s2322_s1, 1 }
  0x17   : > { %s2972_s27 = scalar_select %p529_p1, %s2804_s24, %s531_s2  }
  0x18   : > { %p2974_p5 = por %p542_p2, %p541_p0  ;;  %p2978_p6 = por %p548_p4, %p547_p3 }
  0x19   : > { %3499 = sst [smem:[#allocation13_spill]] %s2972_s27  ;;  %p2325_p7 = scmp.ge.s32.totalorder %s2808_s25, 1 }
  0x1a   : > { %s3500_s7 = scalar_select %p2974_p5, 1, 0 }
  0x1b   : > { %s3502_s28 = scalar_select %p2978_p6, 1, 0 }
  0x1c   : > { %3501 = sst [smem:[#allocation14_spill]] %s3500_s7  ;;  %p640_p8 = scmp.lt.s32.totalorder %s2808_s25, 3 }
  0x1d   : > { %3503 = sst [smem:[#allocation15_spill]] %s3502_s28 }
  0x1e   : > { %p641_p9 = pnand %p2325_p7, %p640_p8 }
  0x1f   : > { %p704_p10 = scmp.lt.s32.totalorder (!%p641_p9), %s2957_s5, 1  ;;  %s3504_s0 = sld [smem:[#allocation18_spill]] (!%p641_p9) }
  0x20   : > { %644 = sbr.rel (%p641_p9) target bundleno = 2177 (0x881), region = 112  ;;  %s3505_s24 = sld [smem:[#allocation19_spill]] (!%p641_p9) }
  0x21   : > { %s3507_s23 = sld [smem:[#allocation16_spill]] (!%p641_p9)  ;;  %s2811_s29 = smov (!%p641_p9), 1  }
  0x22   : > { %s3508_s22 = sld [smem:[#allocation17_spill]] (!%p641_p9)  ;;  %s2358_s27 = sshll.u32 (!%p641_p9), %s2957_s5, 6 }
  0x23   : > { %s3511_s1 = sld [smem:[#allocation20_spill]] (!%p641_p9) }
  0x24   : > { %s3512_s6 = sld [smem:[#allocation21_spill]] (!%p641_p9) }
  0x25   : > { %vm711_vm0 = vcmask 146432   ;;  %vm714_vm1 = vcmask 140288   ;;  %v2810_v0 = vmov 0.0   ;;  %v736_v1 = vld [vmem:[%s3504_s0 + $0x10] sm:$0x3]  ;;  %vm743_vm2 = vcmask 1041408  }
  0x26   : > { %712 = vst.msk [vmem:[#allocation2] sm:$0xff] %vm711_vm0, %v2810_v0  ;;  %713 = vst.msk [vmem:[#allocation2 + $0x8] sm:$0xff] %vm711_vm0, %v2810_v0  ;;  %v735_v2 = vld [vmem:[%s3504_s0 + $0x8] sm:$0xff]  ;;  %s3506_s26 = smov %s3505_s24  ;;  %v910_v3 = vld [vmem:[%s3505_s24 + $0x10] sm:$0x3]  ;;  %2472 = vmatprep.subr.msk.mxu1 %vm743_vm2, %v736_v1  ;;  %vm724_vm3 = vcmask 138248  }
  0x27   : > { %715 = vst.msk [vmem:[#allocation2 + $0x10] sm:$0x3] %vm714_vm1, %v2810_v0  ;;  %s705_s28 = scalar_select %p704_p10, %s2957_s5, 1  ;;  %2490 = vmatprep.subr.msk.mxu0 %vm743_vm2, %v910_v3  ;;  %v909_v4 = vld [vmem:[%s3506_s26 + $0x8] sm:$0xff]  ;;  %2473 = vmatpush3.msk.msra.mxu1 %vm743_vm2, %v736_v1  ;;  %v734_v5 = vld [vmem:[%s3504_s0] sm:$0xff]  ;;  %vm2812_vm4 = vmmov 0  }
  0x28   : > { %2491 = vmatpush3.msk.msra.mxu0 %vm743_vm2, %v910_v3  ;;  %v908_v6 = vld [vmem:[%s3506_s26] sm:$0xff]  ;;  %2474 = vmatprep.subr.mxu1 %v735_v2  ;;  %v731_v7 = vld [vmem:[%s3508_s22 + $0x10] sm:$0x3]  ;;  %v730_v13 = vld [vmem:[%s3508_s22 + $0x8] sm:$0xff]  ;;  %vm1009_vm5 = vcmask 130048   ;;  %s3514_s8 = sld [smem:[#allocation24_spill]] }
  0x29   : > { %s2361_s24 = sshll.u32 %s705_s28, 4  ;;  %2492 = vmatprep.subr.mxu0 %v909_v4  ;;  %2475 = vmatpush3.msra.mxu1 %v735_v2  ;;  %v729_v18 = vld [vmem:[%s3508_s22] sm:$0xff]  ;;  %vm1166_vm6 = vcmask 523264   ;;  %s3515_s9 = sld [smem:[#allocation25_spill]]  ;;  %vm1319_vm7 = vcmask 326656   ;;  %vm1321_vm8 = vcmask 320512  }
  0x2a   : > { %s708_s4 = scalar_lea.vmem %s3507_s23, %s2361_s24  ;;  %2493 = vmatpush3.msra.mxu0 %v909_v4  ;;  %2476 = vmatprep.subr.mxu1 %v734_v5  ;;  %s3509_s24 = sld [smem:[#allocation23_spill]]  ;;  %v2338_v29 = vld [vmem:[%s3511_s1] ss:$0 sm:$0xff]  ;;  %1320 = vst.msk [vmem:[#allocation3] sm:$0xff] %vm1319_vm7, %v2810_v0  ;;  %v1339_v60 = vld [vmem:[%s3454_s10 + $0x18] sm:$0xff]  ;;  %v1338_v62 = vld [vmem:[%s3454_s10 + $0x10] sm:$0xff] }
  0x2b   : > { %v709_v8 = vld [vmem:[%s708_s4] sm:$0xff]  ;;  %2494 = vmatprep.subr.mxu0 %v908_v6  ;;  %2477 = vmatpush3.msra.mxu1 %v734_v5  ;;  %v710_v9 = vld [vmem:[%s708_s4 + $0x8] sm:$0xff]  ;;  %1322 = vst.msk [vmem:[#allocation3 + $0x8] sm:$0x3] %vm1321_vm8, %v2810_v0  ;;  %s2813_s23 = smov 4   ;;  %vm1327_vm9 = vcmask 293920  }
  0x2c   : > { %718 = vrot.lane.b32.xlu0 %v709_v8, %s2811_s29  ;;  %2481 = vmatprep.subr.msk.mxu1 %vm743_vm2, %v731_v7  ;;  %v1008_v39 = vld [vmem:[%s3512_s6] sm:$0xff]  ;;  %v1337_v1 = vld [vmem:[%s3454_s10 + $0x8] sm:$0xff]  ;;  %vm1577_vm10 = vcmask 64512   ;;  %vm1732_vm11 = vcmask 390144   ;;  %vm1738_vm12 = vcmask 322624   ;;  %vm1754_vm13 = vcmask 392192  }
  0x2d   : > { %2495 = vmatpush3.msra.mxu0 %v908_v6  ;;  %v1340_v58 = vld [vmem:[%s3454_s10 + $0x20] sm:$0xff]  ;;  %1733 = vst.msk [vmem:[#allocation4] sm:$0x3f] %vm1732_vm11, %v2810_v0  ;;  %1991 = vst.msk [vmem:[#allocation5] sm:$0x3f] %vm1732_vm11, %v2810_v0  ;;  %s3516_s3 = sld [smem:[#allocation26_spill]] }
  0x2e   : > { %2513 = vmatprep.subr.mxu0 %v2810_v0  ;;  %v1247_v41 = vld [vmem:[%s3514_s8 + $0x38] sm:$0xff]  ;;  %v1246_v42 = vld [vmem:[%s3514_s8 + $0x30] sm:$0xff]  ;;  %v1245_v43 = vld [vmem:[%s3514_s8 + $0x28] sm:$0xff]  ;;  %vm2247_vm14 = vcmask 519168   ;;  %s3518_s0 = sld [smem:[#allocation27_spill]]  ;;  %s2815_s28 = smov [#allocation6]  }
  0x2f   : > { %v1244_v44 = vld [vmem:[%s3514_s8 + $0x20] sm:$0xff]  ;;  %v1243_v46 = vld [vmem:[%s3514_s8 + $0x18] sm:$0xff]  ;;  %v1242_v48 = vld [vmem:[%s3514_s8 + $0x10] sm:$0xff] }
  0x30   : > { %720 = vrot.lane.b32.xlu0 %v710_v9, %s2811_s29  ;;  %s3510_s2 = smov %s3509_s24  ;;  %v1165_v20 = vld [vmem:[%s3509_s24 + $0x38] sm:$0xff]  ;;  %s3513_s29 = sld [smem:[#allocation22_spill]]  ;;  %v1241_v50 = vld [vmem:[%s3514_s8 + $0x8] sm:$0xff]  ;;  %v1240_v52 = vld [vmem:[%s3514_s8] sm:$0xff] }
  0x31   : > { %v1164_v21 = vld [vmem:[%s3510_s2 + $0x30] sm:$0xff]  ;;  %v1163_v22 = vld [vmem:[%s3510_s2 + $0x28] sm:$0xff]  ;;  %v1162_v23 = vld [vmem:[%s3510_s2 + $0x20] sm:$0xff] }
  0x32   : > { %v1161_v45 = vld [vmem:[%s3510_s2 + $0x18] sm:$0xff]  ;;  %v1160_v47 = vld [vmem:[%s3510_s2 + $0x10] sm:$0xff]  ;;  %v1159_v49 = vld [vmem:[%s3510_s2 + $0x8] sm:$0xff] }
  0x33   : > { %v1158_v51 = vld [vmem:[%s3510_s2] sm:$0xff]  ;;  %v1333_v61 = vld [vmem:[%s3515_s9 + $0x18] sm:$0xff]  ;;  %v1332_v63 = vld [vmem:[%s3515_s9 + $0x10] sm:$0xff] }
  0x34   : > { %v1334_v59 = vld [vmem:[%s3515_s9 + $0x20] sm:$0xff]  ;;  %v1331_v2 = vld [vmem:[%s3515_s9 + $0x8] sm:$0xff]  ;;  %s2261_s2 = scalar_lea.hbm %s3518_s0, %s2358_s27 }
  0x35   : > { %v1336_v3 = vld [vmem:[%s3454_s10] sm:$0xff] }
  0x36   : > { %v1083_v40 = vld [vmem:[%s3513_s29] sm:$0xff]  ;;  %s701_s29 = sand.u32 1, %s2800_s30  }
  0x37   : > { %v1330_v4 = vld [vmem:[%s3515_s9] sm:$0xff]  ;;  %s2326_s7 = sshll.u32 %s701_s29, 2  ;;  %s2250_s8 = scalar_lea.sflag [#allocation7], %s701_s29 }
  0x38   : > { %s703_s24 = scalar_lea.vmem [#allocation6], %s2326_s7 }
  0x39   : > { %s2263_s6 = sshll.u32 %s703_s24, 4  ;;  %s2264_s6 = int_to_ptr.vmem [resolvable:$true] %s2263_s6 }
  0x3a   : > { %s2748_s9 = scalar_lea.vmem %s2264_s6, 64 }
  0x3b   : > { %p2749_p11 = scmp.ne.s32.totalorder %s2264_s6, %s2748_s9 }
  0x3d   : > { %p2750_p12 = pnand %p2749_p11, %p2974_p5 }
  0x3f   : > { %p2751_p13 = pneg %p2750_p12 }
  0x9e   : > { %v719_v10 = vpop.permute.xlu0 %718 }
  0x9f   : > { %725 = vst.msk [vmem:[#allocation2 + $0x1] sm:$0xff] %vm724_vm3, %v719_v10 }
  0xa2   : > { %v721_v11 = vpop.permute.xlu0 %720 }
  0xa3   : > { %726 = vst.msk [vmem:[#allocation2 + $0x9] sm:$0xff] %vm724_vm3, %v721_v11  ;;  %v1492_v11 = vld [vmem:[%s3455_s11 + $0x20] sm:$0xff] }
  0xa6   : > { %v732_v12 = vld [vmem:[#allocation2 + $0x1] sm:$0xff] }
  0xa7   : > { %2478 = vmatprep.mubr.msk.f32.mxu1 %vm711_vm0, %v732_v12  ;;  %v727_v17 = vld [vmem:[#allocation2] sm:$0xff] }
  0xaa   : > { %v733_v14 = vld [vmem:[#allocation2 + $0x9] sm:$0xff] }
  0xab   : > { %v906_v15 = vld [vmem:[#allocation2 + $0x2] sm:$0xff]  ;;  %v907_v16 = vld [vmem:[#allocation2 + $0xa] sm:$0xff]  ;;  %2479 = vmatmul.mubr.msk.f32.vlgmr.msra.gmra.mxu1 %vm711_vm0, %v733_v14  ;;  %v1491_v14 = vld [vmem:[%s3455_s11 + $0x18] sm:$0xff] }
  0xac   : > { %2496 = vmatprep.mubr.msk.f32.mxu0 %vm711_vm0, %v906_v15  ;;  %2482 = vmatpush3.msk.msra.mxu1 %vm743_vm2, %v731_v7  ;;  %v728_v19 = vld [vmem:[#allocation2 + $0x8] sm:$0xff]  ;;  %v1490_v15 = vld [vmem:[%s3455_s11 + $0x10] sm:$0xff] }
  0xad   : > { %2487 = vmatprep.mubr.msk.f32.mxu1 %vm711_vm0, %v727_v17  ;;  %2483 = vmatprep.subr.mxu1 %v730_v13  ;;  %v1488_v17 = vld [vmem:[%s3455_s11] sm:$0xff] }
  0xae   : > { %2497 = vmatmul.mubr.msk.f32.vlgmr.msra.gmra.mxu0 %vm711_vm0, %v907_v16  ;;  %2484 = vmatpush3.msra.mxu1 %v730_v13  ;;  %v1489_v16 = vld [vmem:[%s3455_s11 + $0x8] sm:$0xff] }
  0xaf   : > { %2485 = vmatprep.subr.mxu1 %v729_v18  ;;  %2529 = vmatprep.mubr.msk.f32.mxu0 %vm2812_vm4, %v2810_v0 }
  0xb0   : > { %2486 = vmatpush3.msra.mxu1 %v729_v18  ;;  %2514 = vmatpush3.msra.mxu0 %v1165_v20 }
  0xb1   : > { %2488 = vmatmul.mubr.msk.f32.vlgmr.msra.gmra.mxu1 %vm711_vm0, %v728_v19  ;;  %2499 = vmatprep.subr.mxu1 %v2810_v0 }
  0xb2   : > { %2503 = vmatprep.mubr.msk.f32.mxu1 %vm2812_vm4, %v2810_v0  ;;  %2515 = vmatprep.subr.mxu0 %v2810_v0 }
  0xb3   : > { %2516 = vmatpush3.msra.mxu0 %v1164_v21 }
  0xb4   : > { %2517 = vmatprep.subr.mxu0 %v2810_v0 }
  0xb5   : > { %2518 = vmatpush3.msra.mxu0 %v1163_v22 }
  0xb6   : > { %2519 = vmatprep.subr.mxu0 %v2810_v0 }
  0xb7   : > { %2520 = vmatpush3.msra.mxu0 %v1162_v23 }
  0xb8   : > { %2521 = vmatprep.subr.mxu0 %v2810_v0 }
  0xb9   : > { %2522 = vmatpush3.msra.mxu0 %v1161_v45  ;;  %v1751_v45 = vld [vmem:[%s3460_s16 + $0x18] sm:$0xff] }
  0xba   : > { %2523 = vmatprep.subr.mxu0 %v2810_v0 }
  0xbb   : > { %2524 = vmatpush3.msra.mxu0 %v1160_v47  ;;  %v1905_v47 = vld [vmem:[%s3461_s17 + $0x18] sm:$0xff] }
  0xbc   : > { %2525 = vmatprep.subr.mxu0 %v2810_v0 }
  0xbd   : > { %2526 = vmatpush3.msra.mxu0 %v1159_v49  ;;  %v1904_v49 = vld [vmem:[%s3461_s17 + $0x10] sm:$0xff] }
  0xbe   : > { %2527 = vmatprep.subr.mxu0 %v2810_v0 }
  0xbf   : > { %2528 = vmatpush3.msra.mxu0 %v1158_v51  ;;  %v1748_v51 = vld [vmem:[%s3460_s16] sm:$0xff] }
  0xc0   : > { %2551 = vmatprep.subr.mxu0 %v2810_v0 }
 0x16b   : > { %v2480_v24 = vpop.f32.mrf.mxu1 }
 0x16d   : > { %v813_v25 = vpop.f32.mrf.mxu1 }
 0x16e   : > { %v2498_v26 = vpop.f32.mrf.mxu0 }
 0x170   : > { %v986_v33 = vpop.f32.mrf.mxu0 }
 0x171   : > { %v2489_v27 = vpop.f32.mrf.mxu1 }
 0x172   : > { %v903_v28 = vadd.f32 %v2489_v27, %v2480_v24 }
 0x173   : > { %v897_v30 = vpop.f32.mrf.mxu1 }
 0x174   : > { %v996_v31 = vadd.f32 %v2498_v26, %v903_v28  ;;  %v898_v32 = vadd.f32 %v897_v30, %v813_v25  ;;  %v2346_v25 = vld [vmem:[%s3456_s12] ss:$0 sm:$0xff] }
 0x175   : > { %v1576_v30 = vld [vmem:[%s3457_s13] sm:$0xf] }
 0x176   : > { %v1005_v34 = vadd.f32 %v2338_v29, %v996_v31  ;;  %v995_v35 = vadd.f32 %v986_v33, %v898_v32  ;;  %v1658_v31 = vld [vmem:[%s3458_s14 + $0x38] sm:$0xff]  ;;  %v1657_v32 = vld [vmem:[%s3458_s14 + $0x30] sm:$0xff]  ;;  %v1656_v33 = vld [vmem:[%s3458_s14 + $0x28] sm:$0xff] }
 0x178   : > { %v1007_v36 = vmax.f32 %v1005_v34, 0.0  ;;  %v1004_v37 = vadd.f32 %v2338_v29, %v995_v35  ;;  %v1655_v34 = vld [vmem:[%s3458_s14 + $0x20] sm:$0xff]  ;;  %v1654_v35 = vld [vmem:[%s3458_s14 + $0x18] sm:$0xff] }
 0x17a   : > { %v1006_v38 = vmax.f32 %v1004_v37, 0.0  ;;  %2500 = vmatpush3.msra.mxu1 %v1007_v36  ;;  %v1652_v37 = vld [vmem:[%s3458_s14 + $0x8] sm:$0xff] }
 0x17b   : > { %2501 = vmatprep.subr.mxu1 %v2810_v0 }
 0x17c   : > { %2502 = vmatpush3.msra.mxu1 %v1006_v38 }
 0x17d   : > { %2504 = vmatmul.mubr.msk.f32.vlgmr.msra.gmra.mxu1 %vm1009_vm5, %v1008_v39  ;;  %2506 = vmatprep.subr.mxu1 %v2810_v0 }
 0x17e   : > { %2507 = vmatpush3.msra.mxu1 %v1007_v36  ;;  %2510 = vmatprep.mubr.msk.f32.mxu1 %vm2812_vm4, %v2810_v0  ;;  %v1653_v36 = vld [vmem:[%s3458_s14 + $0x10] sm:$0xff] }
 0x17f   : > { %2508 = vmatprep.subr.mxu1 %v2810_v0 }
 0x180   : > { %2509 = vmatpush3.msra.mxu1 %v1006_v38  ;;  %v1651_v38 = vld [vmem:[%s3458_s14] sm:$0xff] }
 0x181   : > { %2511 = vmatmul.mubr.msk.f32.vlgmr.msra.gmra.mxu1 %vm1009_vm5, %v1083_v40  ;;  %2532 = vmatprep.subr.mxu1 %v2810_v0 }
 0x182   : > { %2533 = vmatpush3.msra.mxu1 %v1247_v41  ;;  %2548 = vmatprep.mubr.msk.f32.mxu1 %vm2812_vm4, %v2810_v0  ;;  %v1753_v41 = vld [vmem:[%s3460_s16 + $0x28] sm:$0xff] }
 0x183   : > { %2534 = vmatprep.subr.mxu1 %v2810_v0 }
 0x184   : > { %2535 = vmatpush3.msra.mxu1 %v1246_v42  ;;  %v1752_v42 = vld [vmem:[%s3460_s16 + $0x20] sm:$0xff] }
 0x185   : > { %2536 = vmatprep.subr.mxu1 %v2810_v0 }
 0x186   : > { %2537 = vmatpush3.msra.mxu1 %v1245_v43  ;;  %v1907_v43 = vld [vmem:[%s3461_s17 + $0x28] sm:$0xff] }
 0x187   : > { %2538 = vmatprep.subr.mxu1 %v2810_v0 }
 0x188   : > { %2539 = vmatpush3.msra.mxu1 %v1244_v44  ;;  %v1906_v44 = vld [vmem:[%s3461_s17 + $0x20] sm:$0xff] }
 0x189   : > { %2540 = vmatprep.subr.mxu1 %v2810_v0 }
 0x18a   : > { %2541 = vmatpush3.msra.mxu1 %v1243_v46  ;;  %v1750_v46 = vld [vmem:[%s3460_s16 + $0x10] sm:$0xff] }
 0x18b   : > { %2542 = vmatprep.subr.mxu1 %v2810_v0 }
 0x18c   : > { %2543 = vmatpush3.msra.mxu1 %v1242_v48  ;;  %v1749_v48 = vld [vmem:[%s3460_s16 + $0x8] sm:$0xff] }
 0x18d   : > { %2544 = vmatprep.subr.mxu1 %v2810_v0 }
 0x18e   : > { %2545 = vmatpush3.msra.mxu1 %v1241_v50  ;;  %v1903_v50 = vld [vmem:[%s3461_s17 + $0x8] sm:$0xff] }
 0x18f   : > { %2546 = vmatprep.subr.mxu1 %v2810_v0 }
 0x190   : > { %2547 = vmatpush3.msra.mxu1 %v1240_v52  ;;  %v1902_v52 = vld [vmem:[%s3461_s17] sm:$0xff] }
 0x191   : > { %2564 = vmatprep.subr.mxu1 %v2810_v0 }
 0x23d   : > { %v1079_v53 = vpop.f32.mrf.mxu1 }
 0x23f   : > { %v2505_v54 = vpop.f32.mrf.mxu1 }
 0x241   : > { %v1153_v55 = vpop.f32.mrf.mxu1 }
 0x242   : > { %v1157_v56 = vmax.f32 %v1079_v53, %v1153_v55 }
 0x243   : > { %v2512_v57 = vpop.f32.mrf.mxu1 }
 0x244   : > { %2530 = vmatmul.mubr.msk.f32.vlgmr.msra.gmra.mxu0 %vm1166_vm6, %v1157_v56  ;;  %2549 = vmatmul.mubr.msk.f32.vlgmr.msra.gmra.mxu1 %vm1166_vm6, %v1157_v56  ;;  %v1746_v56 = vld [vmem:[%s3459_s15 + $0x28] sm:$0xff] }
 0x245   : > { %2561 = vmatprep.mubr.msk.f32.mxu0 %vm2812_vm4, %v2810_v0  ;;  %2574 = vmatprep.mubr.msk.f32.mxu1 %vm2812_vm4, %v2810_v0 }
 0x246   : > { %2552 = vmatpush3.msra.mxu0 %v1340_v58  ;;  %2565 = vmatpush3.msra.mxu1 %v1334_v59  ;;  %v1745_v59 = vld [vmem:[%s3459_s15 + $0x20] sm:$0xff] }
 0x247   : > { %2553 = vmatprep.subr.mxu0 %v2810_v0  ;;  %2566 = vmatprep.subr.mxu1 %v2810_v0 }
 0x248   : > { %2554 = vmatpush3.msra.mxu0 %v1339_v60  ;;  %2567 = vmatpush3.msra.mxu1 %v1333_v61  ;;  %v1744_v60 = vld [vmem:[%s3459_s15 + $0x18] sm:$0xff]  ;;  %v1743_v61 = vld [vmem:[%s3459_s15 + $0x10] sm:$0xff] }
 0x249   : > { %2555 = vmatprep.subr.mxu0 %v2810_v0  ;;  %2568 = vmatprep.subr.mxu1 %v2810_v0 }
 0x24a   : > { %2556 = vmatpush3.msra.mxu0 %v1338_v62  ;;  %2569 = vmatpush3.msra.mxu1 %v1332_v63  ;;  %v1742_v62 = vld [vmem:[%s3459_s15 + $0x8] sm:$0xff]  ;;  %v1741_v63 = vld [vmem:[%s3459_s15] sm:$0xff] }
 0x24b   : > { %2557 = vmatprep.subr.mxu0 %v2810_v0  ;;  %2570 = vmatprep.subr.mxu1 %v2810_v0 }
 0x24c   : > { %2558 = vmatpush3.msra.mxu0 %v1337_v1  ;;  %2571 = vmatpush3.msra.mxu1 %v1331_v2  ;;  %v2010_v2 = vld [vmem:[%s3464_s20 + $0x28] sm:$0xff] }
 0x24d   : > { %2559 = vmatprep.subr.mxu0 %v2810_v0  ;;  %2572 = vmatprep.subr.mxu1 %v2810_v0 }
 0x24e   : > { %2560 = vmatpush3.msra.mxu0 %v1336_v3  ;;  %2573 = vmatpush3.msra.mxu1 %v1330_v4  ;;  %v2003_v3 = vld [vmem:[%s3463_s19 + $0x28] sm:$0xff]  ;;  %v2009_v4 = vld [vmem:[%s3464_s20 + $0x20] sm:$0xff] }
 0x24f   : > { %2577 = vmatprep.subr.mxu0 %v2810_v0  ;;  %2590 = vmatprep.subr.mxu1 %v2810_v0 }
 0x304   : > { %v1236_v5 = vpop.f32.mrf.mxu0  ;;  %v1314_v6 = vpop.f32.mrf.mxu1 }
 0x305   : > { %v1318_v7 = vmax.f32 %v1236_v5, %v1314_v6  ;;  %v2002_v5 = vld [vmem:[%s3463_s19 + $0x20] sm:$0xff] }
 0x306   : > { %v2531_v8 = vpop.f32.mrf.mxu0  ;;  %v2550_v9 = vpop.f32.mrf.mxu1 }
 0x307   : > { %1324 = vrot.lane.b32.xlu1 %v1318_v7, %s2813_s23  ;;  %s2814_s23 = smov 8  }
 0x379   : > { %v1325_v10 = vpop.permute.xlu1 %1324 }
 0x37a   : > { %1328 = vst.msk [vmem:[#allocation3 + $0x1] sm:$0xff] %vm1327_vm9, %v1325_v10  ;;  %v2008_v10 = vld [vmem:[%s3464_s20 + $0x18] sm:$0xff] }
 0x381   : > { %v1335_v12 = vld [vmem:[#allocation3 + $0x1] sm:$0xff] }
 0x382   : > { %v1329_v13 = vld [vmem:[#allocation3] sm:$0xff]  ;;  %2562 = vmatmul.mubr.msk.f32.vlgmr.msra.gmra.mxu0 %vm1319_vm7, %v1335_v12  ;;  %v2007_v12 = vld [vmem:[%s3464_s20 + $0x10] sm:$0xff] }
 0x383   : > { %2575 = vmatmul.mubr.msk.f32.vlgmr.msra.gmra.mxu1 %vm1319_vm7, %v1329_v13  ;;  %2578 = vmatpush3.msra.mxu0 %v1492_v11  ;;  %v1487_v18 = vld [vmem:[#allocation3 + $0x2] sm:$0xff]  ;;  %v2000_v13 = vld [vmem:[%s3463_s19 + $0x10] sm:$0xff] }
 0x384   : > { %2587 = vmatprep.mubr.msk.f32.mxu0 %vm2812_vm4, %v2810_v0  ;;  %2579 = vmatprep.subr.mxu0 %v2810_v0  ;;  %v2001_v11 = vld [vmem:[%s3463_s19 + $0x18] sm:$0xff] }
 0x385   : > { %2592 = vmatprep.mubr.msk.f32.mxu1 %vm2812_vm4, %v2810_v0  ;;  %2580 = vmatpush3.msra.mxu0 %v1491_v14  ;;  %v2006_v14 = vld [vmem:[%s3464_s20 + $0x8] sm:$0xff] }
 0x386   : > { %2581 = vmatprep.subr.mxu0 %v2810_v0 }
 0x387   : > { %2582 = vmatpush3.msra.mxu0 %v1490_v15  ;;  %v1999_v15 = vld [vmem:[%s3463_s19 + $0x8] sm:$0xff] }
 0x388   : > { %2583 = vmatprep.subr.mxu0 %v2810_v0 }
 0x389   : > { %2584 = vmatpush3.msra.mxu0 %v1489_v16  ;;  %v2005_v16 = vld [vmem:[%s3464_s20] sm:$0xff] }
 0x38a   : > { %2585 = vmatprep.subr.mxu0 %v2810_v0 }
 0x38b   : > { %2586 = vmatpush3.msra.mxu0 %v1488_v17 }
 0x38c   : > { %2588 = vmatmul.mubr.msk.f32.vlgmr.msra.gmra.mxu0 %vm1319_vm7, %v1487_v18  ;;  %2614 = vmatprep.subr.mxu0 %v2810_v0  ;;  %v1998_v18 = vld [vmem:[%s3463_s19] sm:$0xff] }
 0x38d   : > { %2626 = vmatprep.mubr.msk.f32.mxu0 %vm2812_vm4, %v2810_v0  ;;  %2615 = vmatpush3.msra.mxu0 %v1753_v41  ;;  %v2356_v41 = vld [vmem:[%s3516_s3] ss:$0 sm:$0xff] }
 0x38e   : > { %2616 = vmatprep.subr.mxu0 %v2810_v0 }
 0x38f   : > { %2617 = vmatpush3.msra.mxu0 %v1752_v42 }
 0x390   : > { %2618 = vmatprep.subr.mxu0 %v2810_v0 }
 0x391   : > { %2619 = vmatpush3.msra.mxu0 %v1751_v45 }
 0x392   : > { %2620 = vmatprep.subr.mxu0 %v2810_v0 }
 0x393   : > { %2621 = vmatpush3.msra.mxu0 %v1750_v46 }
 0x394   : > { %2622 = vmatprep.subr.mxu0 %v2810_v0 }
 0x395   : > { %2623 = vmatpush3.msra.mxu0 %v1749_v48 }
 0x396   : > { %2624 = vmatprep.subr.mxu0 %v2810_v0 }
 0x397   : > { %2625 = vmatpush3.msra.mxu0 %v1748_v51 }
 0x398   : > { %2629 = vmatprep.subr.mxu0 %v2810_v0 }
 0x442   : > { %v1410_v19 = vpop.f32.mrf.mxu0 }
 0x443   : > { %v1483_v20 = vpop.f32.mrf.mxu1 }
 0x444   : > { %v2563_v21 = vpop.f32.mrf.mxu0  ;;  %v1484_v23 = vadd.f32 %v1483_v20, %v1410_v19 }
 0x445   : > { %v2576_v22 = vpop.f32.mrf.mxu1  ;;  %v2352_v21 = vld [vmem:[%s3462_s18] ss:$0 sm:$0xff] }
 0x44c   : > { %v1562_v24 = vpop.f32.mrf.mxu0 }
 0x44d   : > { %v1566_v26 = vadd.f32 %v1562_v24, %v1484_v23 }
 0x44e   : > { %v2589_v27 = vpop.f32.mrf.mxu0 }
 0x44f   : > { %v1574_v28 = vadd.f32 %v2346_v25, %v1566_v26  ;;  %v2163_v26 = vld [vmem:[%s3465_s21 + $0x28] sm:$0xff] }
 0x451   : > { %v1575_v29 = vmax.f32 %v1574_v28, 0.0 }
 0x453   : > { %2591 = vmatpush3.msra.mxu1 %v1575_v29  ;;  %v2162_v29 = vld [vmem:[%s3465_s21 + $0x20] sm:$0xff] }
 0x454   : > { %2593 = vmatmul.mubr.msk.f32.vlgmr.msra.gmra.mxu1 %vm1577_vm10, %v1576_v30  ;;  %2595 = vmatprep.subr.mxu1 %v2810_v0  ;;  %v2161_v30 = vld [vmem:[%s3465_s21 + $0x18] sm:$0xff] }
 0x455   : > { %2596 = vmatpush3.msra.mxu1 %v1658_v31  ;;  %2611 = vmatprep.mubr.msk.f32.mxu1 %vm2812_vm4, %v2810_v0  ;;  %v2160_v31 = vld [vmem:[%s3465_s21 + $0x10] sm:$0xff] }
 0x456   : > { %2597 = vmatprep.subr.mxu1 %v2810_v0 }
 0x457   : > { %2598 = vmatpush3.msra.mxu1 %v1657_v32  ;;  %v2159_v32 = vld [vmem:[%s3465_s21 + $0x8] sm:$0xff] }
 0x458   : > { %2599 = vmatprep.subr.mxu1 %v2810_v0 }
 0x459   : > { %2600 = vmatpush3.msra.mxu1 %v1656_v33  ;;  %v2158_v33 = vld [vmem:[%s3465_s21] sm:$0xff] }
 0x45a   : > { %2601 = vmatprep.subr.mxu1 %v2810_v0 }
 0x45b   : > { %2602 = vmatpush3.msra.mxu1 %v1655_v34 }
 0x45c   : > { %2603 = vmatprep.subr.mxu1 %v2810_v0 }
 0x45d   : > { %2604 = vmatpush3.msra.mxu1 %v1654_v35 }
 0x45e   : > { %2605 = vmatprep.subr.mxu1 %v2810_v0 }
 0x45f   : > { %2606 = vmatpush3.msra.mxu1 %v1653_v36 }
 0x460   : > { %2607 = vmatprep.subr.mxu1 %v2810_v0 }
 0x461   : > { %2608 = vmatpush3.msra.mxu1 %v1652_v37 }
 0x462   : > { %2609 = vmatprep.subr.mxu1 %v2810_v0 }
 0x463   : > { %2610 = vmatpush3.msra.mxu1 %v1651_v38 }
 0x464   : > { %2644 = vmatprep.subr.mxu1 %v2810_v0 }
 0x514   : > { %v1647_v39 = vpop.f32.mrf.mxu1 }
 0x515   : > { %2612 = vmatmul.mubr.msk.f32.vlgmr.msra.gmra.mxu1 %vm1166_vm6, %v1647_v39 }
 0x516   : > { %v2594_v40 = vpop.f32.mrf.mxu1  ;;  %2656 = vmatprep.mubr.msk.f32.mxu1 %vm2812_vm4, %v2810_v0  ;;  %2645 = vmatpush3.msra.mxu1 %v1907_v43 }
 0x517   : > { %2646 = vmatprep.subr.mxu1 %v2810_v0 }
 0x518   : > { %2647 = vmatpush3.msra.mxu1 %v1906_v44 }
 0x519   : > { %2648 = vmatprep.subr.mxu1 %v2810_v0 }
 0x51a   : > { %2649 = vmatpush3.msra.mxu1 %v1905_v47 }
 0x51b   : > { %2650 = vmatprep.subr.mxu1 %v2810_v0 }
 0x51c   : > { %2651 = vmatpush3.msra.mxu1 %v1904_v49 }
 0x51d   : > { %2652 = vmatprep.subr.mxu1 %v2810_v0 }
 0x51e   : > { %2653 = vmatpush3.msra.mxu1 %v1903_v50 }
 0x51f   : > { %2654 = vmatprep.subr.mxu1 %v2810_v0 }
 0x520   : > { %2655 = vmatpush3.msra.mxu1 %v1902_v52 }
 0x521   : > { %2674 = vmatprep.subr.mxu1 %v2810_v0 }
 0x5d5   : > { %v1728_v53 = vpop.f32.mrf.mxu1 }
 0x5d6   : > { %1735 = vrot.lane.b32.xlu1 %v1728_v53, %s2814_s23 }
 0x5d7   : > { %v2613_v54 = vpop.f32.mrf.mxu1 }
 0x648   : > { %v1736_v55 = vpop.permute.xlu1 %1735 }
 0x649   : > { %1739 = vst.msk [vmem:[#allocation4 + $0x1] sm:$0xf] %vm1738_vm12, %v1736_v55 }
 0x650   : > { %v1747_v57 = vld [vmem:[#allocation4 + $0x1] sm:$0xf] }
 0x651   : > { %v1901_v58 = vld [vmem:[#allocation4 + $0x2] sm:$0xf]  ;;  %2627 = vmatmul.mubr.msk.f32.vlgmr.msra.gmra.mxu0 %vm1754_vm13, %v1747_v57 }
 0x652   : > { %2657 = vmatmul.mubr.msk.f32.vlgmr.msra.gmra.mxu1 %vm1754_vm13, %v1901_v58  ;;  %2630 = vmatpush3.msra.mxu0 %v1746_v56  ;;  %v1740_v1 = vld [vmem:[#allocation4] sm:$0xf] }
 0x653   : > { %2641 = vmatprep.mubr.msk.f32.mxu0 %vm2812_vm4, %v2810_v0  ;;  %2631 = vmatprep.subr.mxu0 %v2810_v0 }
 0x654   : > { %2686 = vmatprep.mubr.msk.f32.mxu1 %vm2812_vm4, %v2810_v0  ;;  %2632 = vmatpush3.msra.mxu0 %v1745_v59 }
 0x655   : > { %2633 = vmatprep.subr.mxu0 %v2810_v0  ;;  %2675 = vmatpush3.msra.mxu1 %v2003_v3 }
 0x656   : > { %2634 = vmatpush3.msra.mxu0 %v1744_v60  ;;  %2676 = vmatprep.subr.mxu1 %v2810_v0 }
 0x657   : > { %2635 = vmatprep.subr.mxu0 %v2810_v0  ;;  %2677 = vmatpush3.msra.mxu1 %v2002_v5 }
 0x658   : > { %2636 = vmatpush3.msra.mxu0 %v1743_v61  ;;  %2678 = vmatprep.subr.mxu1 %v2810_v0 }
 0x659   : > { %2637 = vmatprep.subr.mxu0 %v2810_v0  ;;  %2679 = vmatpush3.msra.mxu1 %v2001_v11 }
 0x65a   : > { %2638 = vmatpush3.msra.mxu0 %v1742_v62  ;;  %2680 = vmatprep.subr.mxu1 %v2810_v0 }
 0x65b   : > { %2639 = vmatprep.subr.mxu0 %v2810_v0  ;;  %2681 = vmatpush3.msra.mxu1 %v2000_v13 }
 0x65c   : > { %2640 = vmatpush3.msra.mxu0 %v1741_v63  ;;  %2682 = vmatprep.subr.mxu1 %v2810_v0 }
 0x65d   : > { %2642 = vmatmul.mubr.msk.f32.vlgmr.msra.gmra.mxu0 %vm1754_vm13, %v1740_v1  ;;  %2659 = vmatprep.subr.mxu0 %v2810_v0 }
 0x65e   : > { %2671 = vmatprep.mubr.msk.f32.mxu0 %vm2812_vm4, %v2810_v0  ;;  %2660 = vmatpush3.msra.mxu0 %v2010_v2 }
 0x65f   : > { %2661 = vmatprep.subr.mxu0 %v2810_v0  ;;  %2683 = vmatpush3.msra.mxu1 %v1999_v15 }
 0x660   : > { %2662 = vmatpush3.msra.mxu0 %v2009_v4  ;;  %2684 = vmatprep.subr.mxu1 %v2810_v0 }
 0x661   : > { %2663 = vmatprep.subr.mxu0 %v2810_v0  ;;  %2685 = vmatpush3.msra.mxu1 %v1998_v18 }
 0x662   : > { %2664 = vmatpush3.msra.mxu0 %v2008_v10 }
 0x663   : > { %2665 = vmatprep.subr.mxu0 %v2810_v0 }
 0x664   : > { %2666 = vmatpush3.msra.mxu0 %v2007_v12 }
 0x665   : > { %2667 = vmatprep.subr.mxu0 %v2810_v0 }
 0x666   : > { %2668 = vmatpush3.msra.mxu0 %v2006_v14 }
 0x667   : > { %2669 = vmatprep.subr.mxu0 %v2810_v0 }
 0x668   : > { %2670 = vmatpush3.msra.mxu0 %v2005_v16 }
 0x669   : > { %2689 = vmatprep.subr.mxu0 %v2810_v0 }
 0x711   : > { %v1824_v6 = vpop.f32.mrf.mxu0 }
 0x712   : > { %v1977_v7 = vpop.f32.mrf.mxu1 }
 0x713   : > { %v2628_v8 = vpop.f32.mrf.mxu0 }
 0x714   : > { %v2658_v9 = vpop.f32.mrf.mxu1 }
 0x71d   : > { %v1897_v17 = vpop.f32.mrf.mxu0 }
 0x71e   : > { %v1898_v19 = vadd.f32 %v1897_v17, %v1824_v6 }
 0x71f   : > { %v2643_v20 = vpop.f32.mrf.mxu0 }
 0x720   : > { %v1981_v22 = vadd.f32 %v1977_v7, %v1898_v19 }
 0x722   : > { %v1989_v23 = vadd.f32 %v2352_v21, %v1981_v22 }
 0x724   : > { %v1990_v24 = vmax.f32 %v1989_v23, 0.0 }
 0x726   : > { %1993 = vrot.lane.b32.xlu0 %v1990_v24, %s2814_s23  ;;  %s2752_s23 = sshll.u32 %s2815_s28, 4  ;;  %s2753_s23 = int_to_ptr.vmem [resolvable:$false] %s2752_s23 }
 0x727   : > { %s2754_s5 = scalar_lea.vmem %s2753_s23, 128  ;;  %p2755_p0 = scmp.lt.s32.totalorder %s2264_s6, %s2753_s23 }
 0x728   : > { %p2756_p1 = scmp.lt.s32.totalorder %s2754_s5, %s2748_s9 }
 0x72a   : > { %p2757_p2 = por %p2756_p1, %p2755_p0 }
 0x72c   : > { %p2758_p3 = pnand %p2757_p2, %p2751_p13 }
 0x798   : > { %v1994_v25 = vpop.permute.xlu0 %1993 }
 0x799   : > { %1996 = vst.msk [vmem:[#allocation5 + $0x1] sm:$0xf] %vm1738_vm12, %v1994_v25 }
 0x7a0   : > { %v2004_v27 = vld [vmem:[#allocation5 + $0x1] sm:$0xf] }
 0x7a1   : > { %v1997_v28 = vld [vmem:[#allocation5] sm:$0xf]  ;;  %2672 = vmatmul.mubr.msk.f32.vlgmr.msra.gmra.mxu0 %vm1754_vm13, %v2004_v27 }
 0x7a2   : > { %2687 = vmatmul.mubr.msk.f32.vlgmr.msra.gmra.mxu1 %vm1754_vm13, %v1997_v28  ;;  %2690 = vmatpush3.msra.mxu0 %v2163_v26  ;;  %v2157_v34 = vld [vmem:[#allocation5 + $0x2] sm:$0xf] }
 0x7a3   : > { %2701 = vmatprep.mubr.msk.f32.mxu0 %vm2812_vm4, %v2810_v0  ;;  %2691 = vmatprep.subr.mxu0 %v2810_v0 }
 0x7a4   : > { %2692 = vmatpush3.msra.mxu0 %v2162_v29 }
 0x7a5   : > { %2693 = vmatprep.subr.mxu0 %v2810_v0 }
 0x7a6   : > { %2694 = vmatpush3.msra.mxu0 %v2161_v30 }
 0x7a7   : > { %2695 = vmatprep.subr.mxu0 %v2810_v0 }
 0x7a8   : > { %2696 = vmatpush3.msra.mxu0 %v2160_v31 }
 0x7a9   : > { %2697 = vmatprep.subr.mxu0 %v2810_v0 }
 0x7aa   : > { %2698 = vmatpush3.msra.mxu0 %v2159_v32 }
 0x7ab   : > { %2699 = vmatprep.subr.mxu0 %v2810_v0 }
 0x7ac   : > { %2700 = vmatpush3.msra.mxu0 %v2158_v33 }
 0x7ad   : > { %2702 = vmatmul.mubr.msk.f32.vlgmr.msra.gmra.mxu0 %vm1754_vm13, %v2157_v34 }
 0x861   : > { %v2080_v35 = vpop.f32.mrf.mxu0 }
 0x862   : > { %v2153_v36 = vpop.f32.mrf.mxu1 }
 0x863   : > { %v2673_v37 = vpop.f32.mrf.mxu0  ;;  %v2154_v39 = vadd.f32 %v2153_v36, %v2080_v35 }
 0x864   : > { %v2688_v38 = vpop.f32.mrf.mxu1 }
 0x86d   : > { %v2233_v40 = vpop.f32.mrf.mxu0 }
 0x86e   : > { %v2237_v42 = vadd.f32 %v2233_v40, %v2154_v39 }
 0x86f   : > { %v2703_v43 = vpop.f32.mrf.mxu0 }
 0x870   : > { %v2245_v0 = vadd.f32 %v2356_v41, %v2237_v42 }
 0x872   : > { %v2246_v44 = vmax.f32 %v2245_v0, 0.0 }
 0x874   : > { %2248 = vst.msk [vmem:[%s703_s24] sm:$0xf] %vm2247_vm14, %v2246_v44 }
 0x875   : > { %2761 = shalt.err (!%p2758_p3)
}
 0x876   : > { %s2762_s7 = scalar_lea.hbm %s2261_s2, 64  ;;  %s2766_s27 = scalar_lea.hbm %s3518_s0, 128 }
 0x877   : > { %p2763_p4 = scmp.ne.s32.totalorder %s2261_s2, %s2762_s7  ;;  %p2767_p9 = scmp.lt.s32.totalorder %s2261_s2, %s3518_s0 }
 0x878   : > { %p2768_p10 = scmp.lt.s32.totalorder %s2766_s27, %s2762_s7 }
 0x879   : > { %p2764_p7 = pnand %p2763_p4, %p2974_p5 }
 0x87a   : > { %p2769_p11 = por %p2768_p10, %p2767_p9 }
 0x87b   : > { %p2765_p8 = pneg %p2764_p7 }
 0x87d   : > { %p2770_p12 = pnand %p2769_p11, %p2765_p8 }
 0x87f   : > { %2773 = shalt.err (!%p2770_p12)
}
 0x880   : > { %2704 = dma.vmem_to_hbm [thread:$0]  (%p2974_p5), %s2264_s6, 64, %s2261_s2, %s2250_s8  }
 0x881 PF: > { %s3519_s9 = sld [smem:[#allocation11_spill]] }
 0x882   : > { %s3520_s25 = sld [smem:[#allocation9_spill]] }
 0x887   : > { %p2710_p13 = scmp.ge.s32.totalorder %s3519_s9, 2 }
 0x888   : > { %s2275_s23 = sand.u32 1, %s3520_s25  }
 0x889   : > { %p2707_p0 = pnand %p2710_p13, %p2978_p6  ;;  %s2276_s5 = scalar_lea.sflag [#allocation7], %s2275_s23 }
 0x88b   : > { %p2708_p1 = pneg %p2707_p0 }
 0x88d   : > { %2791 = dma.done.wait (%p2708_p1), %s2276_s5, 64  }
 0x88e   : > { %2793 = vsyncadd (%p2708_p1), %s2276_s5, 4294967232  ;;  %s3522_s25 = sld [smem:[#allocation12_spill]]  ;;  %s3525_s4 = smov %s2800_s30 }
 0x88f   : > { %s3523_s7 = sld [smem:[#allocation10_spill]] }
 0x890   : > { %s3524_s24 = sld [smem:[#allocation13_spill]] }
 0x894   : > { %p33_p2 = scmp.ge.s32.totalorder %s3522_s25, 4  }
 0x895   : > { %s3526_s30 = smov %s3523_s7 }
 0x896   :  { %35 = sbr.rel (!%p33_p2) target bundleno = 16 (0x10), region = 147 }
 0x89b   :  { %2281 = vsyncpa [#allocation7], 1 }
 0x89c   :  { %2283 = vsyncpa [#allocation7 + $0x1], 1 }

</bundles_post_ra>
